<compile_context>
chip_gen: v5e
topology: v5e:2x2
jax: 0.10.0
libtpu: 0.0.40
codegen_flags: <defaults>
</compile_context>

<pallas_src>
import functools

import numpy as np
import jax
import jax.numpy as jnp
from jax import lax
from jax.experimental import pallas as pl
from jax.experimental.pallas import tpu as pltpu

EPS_BN = 1e-5
EPS_LN = 1e-5
LANES = 128


# ---------------------------------------------------------------------------
# small math helpers (usable both inside the kernel and in glue code)
# ---------------------------------------------------------------------------
def _erf_approx(x):
    # Abramowitz & Stegun 7.1.26 rational approximation, |err| < 1.5e-7
    # (float32-exact for torch.nn.GELU purposes).  Used in-kernel because
    # lax.erf has no guaranteed Mosaic lowering.
    a1, a2, a3, a4, a5 = 0.254829592, -0.284496736, 1.421413741, -1.453152027, 1.061405429
    p = 0.3275911
    sgn = jnp.where(x >= 0.0, 1.0, -1.0)
    ax = jnp.abs(x)
    t = 1.0 / (1.0 + p * ax)
    poly = ((((a5 * t + a4) * t + a3) * t + a2) * t + a1) * t
    return sgn * (1.0 - poly * jnp.exp(-ax * ax))


def _gelu(x):
    return 0.5 * x * (1.0 + _erf_approx(x * 0.7071067811865476))


def _layernorm(x, g, b):
    mu = jnp.mean(x, axis=-1, keepdims=True)
    var = jnp.mean(jnp.square(x - mu), axis=-1, keepdims=True)
    return (x - mu) * lax.rsqrt(var + EPS_LN) * g + b


def _folded_conv(sel_rows, sel_cols_w, inp):
    """sum_kh (sel_rows[kh] @ inp) @ sel_cols_w[kh].

    A 3x3 conv whose vertical taps / stride / zero padding live in the
    constant row-selection matrices and whose horizontal taps / stride /
    padding / weights live in the folded column matrices.  Pure 2-D MXU dots,
    no im2col, no pad, no strided slicing.
    """
    acc = None
    for kh in range(3):
        rows = jnp.dot(sel_rows[kh], inp, preferred_element_type=jnp.float32)
        part = jnp.dot(rows, sel_cols_w[kh], preferred_element_type=jnp.float32)
        acc = part if acc is None else acc + part
    return acc


# ---------------------------------------------------------------------------
# the fused Pallas kernel
# ---------------------------------------------------------------------------
def _global_pred_kernel(x_ref, r1_ref, m1_ref, sc1_ref, sh1_ref,
                        r2_ref, m2_ref, sc2_ref, sh2_ref,
                        r3_ref, mdw_ref, bdw_ref,
                        n1g_ref, n1b_ref, q_ref, wkv_ref, wpt_ref, bp_ref,
                        n2g_ref, n2b_ref, wh_ref, bhb_ref,
                        o_ref, tok_ref, *, scale):
    B = x_ref.shape[0]
    H, W = x_ref.shape[2], x_ref.shape[3]
    H2, W2 = H // 4, W // 4
    N = H2 * W2
    C = n1g_ref.shape[1]
    lanes = o_ref.shape[2]

    # hoist parameter loads out of the (unrolled) batch loops
    r1 = [r1_ref[k] for k in range(3)]
    m1 = [m1_ref[k] for k in range(3)]
    r2 = [r2_ref[k] for k in range(3)]
    m2 = [m2_ref[k] for k in range(3)]
    r3 = [r3_ref[k] for k in range(3)]
    mdw = [mdw_ref[k] for k in range(3)]
    sc1, sh1 = sc1_ref[...], sh1_ref[...]
    sc2, sh2 = sc2_ref[...], sh2_ref[...]
    bdw = bdw_ref[...]

    # ---- trunk: channel-max -> conv1+BN+GELU -> conv2+BN -> depthwise
    #      pos-embed + bias + residual (per image; B is tiny, unrolled).
    for b in range(B):
        xm = jnp.max(x_ref[b], axis=0)                     # (H, W)  channel max (VPU)
        y1 = _gelu(_folded_conv(r1, m1, xm) * sc1 + sh1)   # (H/2, W/2*Cmid)
        y2 = _folded_conv(r2, m2, y1) * sc2 + sh2          # (H/4, W/4*C)
        x1 = y2 + bdw + _folded_conv(r3, mdw, y2)          # + depthwise conv + bias
        # scatter rows into the token layout (B*N, C): channels on the lane axis
        for i in range(H2):
            for j in range(W2):
                n = b * N + i * W2 + j
                tok_ref[n:n + 1, :] = x1[i:i + 1, j * C:(j + 1) * C]

    # ---- head: LN -> single-head query attention -> proj -> +LN -> 3 linears
    n1g, n1b = n1g_ref[...], n1b_ref[...]
    n2g, n2b = n2g_ref[...], n2b_ref[...]
    q, wkv, wpt, bp = q_ref[...], wkv_ref[...], wpt_ref[...], bp_ref[...]
    wh, bhb = wh_ref[...], bhb_ref[...]
    for b in range(B):
        t = _layernorm(tok_ref[b * N:(b + 1) * N, :], n1g, n1b)      # (N, C)
        kv = jnp.dot(t, wkv, preferred_element_type=jnp.float32)     # (N, 2C)
        k, v = kv[:, 0:C], kv[:, C:2 * C]
        logits = lax.dot_general(q, k,
                                 dimension_numbers=(((1,), (1,)), ((), ())),
                                 preferred_element_type=jnp.float32) * scale   # (3, N)
        logits = logits - jnp.max(logits, axis=-1, keepdims=True)
        e = jnp.exp(logits)
        p = e * pl.reciprocal(jnp.sum(e, axis=-1, keepdims=True), approx=False)
        y = jnp.dot(p, v, preferred_element_type=jnp.float32)                  # (3, C)
        y = jnp.dot(y, wpt, preferred_element_type=jnp.float32) + bp
        y = y + _layernorm(y, n2g, n2b)
        heads = jnp.sum(y * wh, axis=-1, keepdims=True) + bhb                  # (3, 1)
        o_ref[b] = jnp.broadcast_to(heads, (3, lanes))                         # lane-dense


# ---------------------------------------------------------------------------
# wrapper: parameter folding (stride / zero-padding / weights -> GEMM matrices)
# ---------------------------------------------------------------------------
def _fold_params(P, H, W):
    H1, W1 = H // 2, W // 2
    H2, W2 = H // 4, W // 4
    Cmid = P['conv1_w'].shape[0]
    C = P['conv2_w'].shape[0]

    # constant 0/1 selection tensors; out-of-range taps are simply dropped,
    # which implements the conv's zero padding.
    r1 = np.zeros((3, H1, H), np.float32)   # rows for conv1 (stride 2, pad 1)
    s1 = np.zeros((3, W, W1), np.float32)   # cols for conv1
    r2 = np.zeros((3, H2, H1), np.float32)  # rows for conv2
    s2 = np.zeros((3, W1, W2), np.float32)  # cols for conv2
    r3 = np.zeros((3, H2, H2), np.float32)  # rows for depthwise (stride 1, pad 1)
    sd = np.zeros((3, W2, W2), np.float32)  # cols for depthwise
    for k in range(3):
        for o in range(H1):
            src = 2 * o + k - 1
            if 0 <= src < H:
                r1[k, o, src] = 1.0
        for o in range(W1):
            src = 2 * o + k - 1
            if 0 <= src < W:
                s1[k, src, o] = 1.0
        for o in range(H2):
            src = 2 * o + k - 1
            if 0 <= src < H1:
                r2[k, o, src] = 1.0
        for o in range(W2):
            src = 2 * o + k - 1
            if 0 <= src < W1:
                s2[k, src, o] = 1.0
        for o in range(H2):
            src = o + k - 1
            if 0 <= src < H2:
                r3[k, o, src] = 1.0
        for o in range(W2):
            src = o + k - 1
            if 0 <= src < W2:
                sd[k, src, o] = 1.0

    # conv1:  M1[kh, c, oj*Cmid + ci] = sum_kw w1[ci, kh, kw] * s1[kw, c, oj]
    m1 = jnp.einsum('ihw,wcj->hcji', P['conv1_w'][:, 0], jnp.asarray(s1))
    m1 = m1.reshape(3, W, W1 * Cmid)
    # conv2:  M2[kh, oj*Cmid + ci, o2j*C + c2] = sum_kw w2[c2, ci, kh, kw] * s2[kw, oj, o2j]
    m2 = jnp.einsum('oihw,wpj->hpijo', P['conv2_w'], jnp.asarray(s2))
    m2 = m2.reshape(3, W1 * Cmid, W2 * C)
    # depthwise pos_embed1:
    #   Mdw[kh, j1*C + c1, j*C + c] = delta(c1, c) * sum_kw wdw[c, kh, kw] * sd[kw, j1, j]
    tmp = jnp.einsum('chw,wpj->hpjc', P['pos1_w'][:, 0], jnp.asarray(sd))
    mdw = jnp.einsum('hpjc,dc->hpdjc', tmp, jnp.eye(C, dtype=jnp.float32))
    mdw = mdw.reshape(3, W2 * C, W2 * C)

    # eval-mode BatchNorm folded to scale/shift (conv bias folded into shift),
    # replicated to the flattened (col, channel) layout used by the GEMMs.
    sc1 = P['bn1_g'] * lax.rsqrt(P['bn1_v'] + EPS_BN)
    sh1 = P['bn1_b'] - P['bn1_m'] * sc1 + P['conv1_b'] * sc1
    sc2 = P['bn2_g'] * lax.rsqrt(P['bn2_v'] + EPS_BN)
    sh2 = P['bn2_b'] - P['bn2_m'] * sc2 + P['conv2_b'] * sc2

    folded = dict(
        r1=jnp.asarray(r1), m1=m1,
        sc1=jnp.tile(sc1, W1)[None, :], sh1=jnp.tile(sh1, W1)[None, :],
        r2=jnp.asarray(r2), m2=m2,
        sc2=jnp.tile(sc2, W2)[None, :], sh2=jnp.tile(sh2, W2)[None, :],
        r3=jnp.asarray(r3), mdw=mdw,
        bdw=jnp.tile(P['pos1_b'], W2)[None, :],
        n1g=P['norm1_g'][None, :], n1b=P['norm1_b'][None, :],
        q=P['q'][0],
        wkv=jnp.concatenate([P['k_w'].T, P['v_w'].T], axis=1),   # (C, 2C) = [Wk^T | Wv^T]
        wpt=P['proj_w'].T, bp=P['proj_b'][None, :],
        n2g=P['norm2_g'][None, :], n2b=P['norm2_b'][None, :],
        wh=jnp.stack([P['alpha_w'][0], P['beta_w'][0], P['gamma_w'][0]], axis=0),
        bhb=jnp.stack([P['alpha_b'][0] + 1.0,          # alpha_base folded in
                       P['beta_b'][0],
                       P['gamma_b'][0] + 1.0])[:, None],   # gamma_base folded in
    )
    return folded, C


def global_pred_forward(x, P):
    B, _, H, W = x.shape
    assert H % 4 == 0 and W % 4 == 0
    F, C = _fold_params(P, H, W)
    H2, W2 = H // 4, W // 4
    N = H2 * W2
    scale = float(C) ** -0.5                      # num_heads == 1 -> head_dim == C

    out = pl.pallas_call(
        functools.partial(_global_pred_kernel, scale=scale),
        out_shape=jax.ShapeDtypeStruct((B, 3, LANES), jnp.float32),
        scratch_shapes=[pltpu.VMEM((B * N, C), jnp.float32)],   # token buffer (channels on lanes)
    )(x,
      F['r1'], F['m1'], F['sc1'], F['sh1'],
      F['r2'], F['m2'], F['sc2'], F['sh2'],
      F['r3'], F['mdw'], F['bdw'],
      F['n1g'], F['n1b'], F['q'], F['wkv'], F['wpt'], F['bp'],
      F['n2g'], F['n2b'], F['wh'], F['bhb'])

    res = out[:, :, 0]                            # (B, 3)
    return res[:, 0:1], res[:, 1:2], res[:, 2:3]  # alpha, beta, gamma


# ---------------------------------------------------------------------------
# deterministic synthetic parameters (shapes match the module's __init__)
# ---------------------------------------------------------------------------
def init_params(key, in_channels=1, out_channels=16):
    mid = out_channels // 2
    ks = jax.random.split(key, 32)

    def nrm(k, shape, s=0.1):
        return (s * jax.random.normal(k, shape)).astype(jnp.float32)

    return {
        # conv_embedding
        'conv1_w': nrm(ks[0], (mid, in_channels, 3, 3)),
        'conv1_b': nrm(ks[1], (mid,)),
        'bn1_g': 1.0 + nrm(ks[2], (mid,)),
        'bn1_b': nrm(ks[3], (mid,)),
        'bn1_m': nrm(ks[4], (mid,)),
        'bn1_v': 1.0 + 0.1 * jax.random.uniform(ks[5], (mid,), dtype=jnp.float32),
        'conv2_w': nrm(ks[6], (out_channels, mid, 3, 3)),
        'conv2_b': nrm(ks[7], (out_channels,)),
        'bn2_g': 1.0 + nrm(ks[8], (out_channels,)),
        'bn2_b': nrm(ks[9], (out_channels,)),
        'bn2_m': nrm(ks[10], (out_channels,)),
        'bn2_v': 1.0 + 0.1 * jax.random.uniform(ks[11], (out_channels,), dtype=jnp.float32),
        # query_SABlock (pos_embed2 is unused by forward)
        'pos1_w': nrm(ks[12], (out_channels, 1, 3, 3)),
        'pos1_b': nrm(ks[13], (out_channels,)),
        'norm1_g': 1.0 + nrm(ks[14], (out_channels,)),
        'norm1_b': nrm(ks[15], (out_channels,)),
        'norm2_g': 1.0 + nrm(ks[16], (out_channels,)),
        'norm2_b': nrm(ks[17], (out_channels,)),
        # query_Attention
        'q': jnp.ones((1, 3, out_channels), jnp.float32),
        'k_w': nrm(ks[18], (out_channels, out_channels)),   # bias=False
        'v_w': nrm(ks[19], (out_channels, out_channels)),   # bias=False
        'proj_w': nrm(ks[20], (out_channels, out_channels)),
        'proj_b': nrm(ks[21], (out_channels,)),
        # heads
        'alpha_w': nrm(ks[22], (1, out_channels)),
        'alpha_b': nrm(ks[23], (1,)),
        'beta_w': nrm(ks[24], (1, out_channels)),
        'beta_b': nrm(ks[25], (1,)),
        'gamma_w': nrm(ks[26], (1, out_channels)),
        'gamma_b': nrm(ks[27], (1,)),
    }


# ---------------------------------------------------------------------------
# independent pure-JAX reference (lax.conv + exact erf GELU) for validation
# ---------------------------------------------------------------------------
def reference_forward(x, P):
    xm = jnp.max(x, axis=1, keepdims=True)

    def conv_bn(xin, w, b, g, beta, m, v, act):
        y = lax.conv_general_dilated(xin, w, window_strides=(2, 2),
                                     padding=((1, 1), (1, 1)),
                                     dimension_numbers=('NCHW', 'OIHW', 'NCHW'))
        y = y + b[None, :, None, None]
        sc = g / jnp.sqrt(v + EPS_BN)
        y = y * sc[None, :, None, None] + (beta - m * sc)[None, :, None, None]
        if act:
            y = 0.5 * y * (1.0 + lax.erf(y * (2.0 ** -0.5)))
        return y

    h1 = conv_bn(xm, P['conv1_w'], P['conv1_b'], P['bn1_g'], P['bn1_b'],
                 P['bn1_m'], P['bn1_v'], True)
    h2 = conv_bn(h1, P['conv2_w'], P['conv2_b'], P['bn2_g'], P['bn2_b'],
                 P['bn2_m'], P['bn2_v'], False)

    B, C = h2.shape[0], h2.shape[1]
    pos = lax.conv_general_dilated(h2, P['pos1_w'], window_strides=(1, 1),
                                   padding=((1, 1), (1, 1)),
                                   dimension_numbers=('NCHW', 'OIHW', 'NCHW'),
                                   feature_group_count=C)
    x1 = h2 + pos + P['pos1_b'][None, :, None, None]
    tokens = x1.reshape(B, C, -1).transpose(0, 2, 1)          # (B, N, C)

    def ln(z, g, b):
        mu = z.mean(-1, keepdims=True)
        var = ((z - mu) ** 2).mean(-1, keepdims=True)
        return (z - mu) / jnp.sqrt(var + EPS_LN) * g + b

    t = ln(tokens, P['norm1_g'], P['norm1_b'])
    k = t @ P['k_w'].T
    v = t @ P['v_w'].T
    q = jnp.broadcast_to(P['q'], (B, 3, C))
    attn = jnp.einsum('bqc,bnc->bqn', q, k) * (float(C) ** -0.5)
    attn = jax.nn.softmax(attn, axis=-1)
    y = jnp.einsum('bqn,bnc->bqc', attn, v)
    y = y @ P['proj_w'].T + P['proj_b']
    y = y + ln(y, P['norm2_g'], P['norm2_b'])
    alpha = y[:, 0, :] @ P['alpha_w'].T + P['alpha_b'] + 1.0
    beta = y[:, 1, :] @ P['beta_w'].T + P['beta_b']
    gamma = y[:, 2, :] @ P['gamma_w'].T + P['gamma_b'] + 1.0
    return alpha, beta, gamma


if __name__ == "__main__":
    key = jax.random.PRNGKey(0)
    pkey, xkey = jax.random.split(key)
    P = init_params(pkey, in_channels=1, out_channels=16)

    B, Cin, H, W = 2, 4, 16, 16
    x = jax.random.normal(xkey, (B, Cin, H, W), dtype=jnp.float32)

    fwd = jax.jit(global_pred_forward)
    alpha, beta, gamma = jax.block_until_ready(fwd(x, P))

    assert alpha.shape == (B, 1) and beta.shape == (B, 1) and gamma.shape == (B, 1)
    ra, rb, rg = reference_forward(x, P)
    for got, ref in ((alpha, ra), (beta, rb), (gamma, rg)):
        assert jnp.allclose(got, ref, atol=1e-3, rtol=1e-3), (got, ref)

    print("KERNEL_OK")
</pallas_src>

<mosaic_0001>
module attributes {stable_mosaic.version = 11 : i64} {
  func.func @_global_pred_kernel(%arg0: memref<2x4x16x16xf32, #tpu.memory_space<vmem>>, %arg1: memref<3x8x16xf32, #tpu.memory_space<vmem>>, %arg2: memref<3x16x64xf32, #tpu.memory_space<vmem>>, %arg3: memref<1x64xf32, #tpu.memory_space<vmem>>, %arg4: memref<1x64xf32, #tpu.memory_space<vmem>>, %arg5: memref<3x4x8xf32, #tpu.memory_space<vmem>>, %arg6: memref<3x64x64xf32, #tpu.memory_space<vmem>>, %arg7: memref<1x64xf32, #tpu.memory_space<vmem>>, %arg8: memref<1x64xf32, #tpu.memory_space<vmem>>, %arg9: memref<3x4x4xf32, #tpu.memory_space<vmem>>, %arg10: memref<3x64x64xf32, #tpu.memory_space<vmem>>, %arg11: memref<1x64xf32, #tpu.memory_space<vmem>>, %arg12: memref<1x16xf32, #tpu.memory_space<vmem>>, %arg13: memref<1x16xf32, #tpu.memory_space<vmem>>, %arg14: memref<3x16xf32, #tpu.memory_space<vmem>>, %arg15: memref<16x32xf32, #tpu.memory_space<vmem>>, %arg16: memref<16x16xf32, #tpu.memory_space<vmem>>, %arg17: memref<1x16xf32, #tpu.memory_space<vmem>>, %arg18: memref<1x16xf32, #tpu.memory_space<vmem>>, %arg19: memref<1x16xf32, #tpu.memory_space<vmem>>, %arg20: memref<3x16xf32, #tpu.memory_space<vmem>>, %arg21: memref<3x1xf32, #tpu.memory_space<vmem>>, %arg22: memref<2x3x128xf32, #tpu.memory_space<vmem>>, %arg23: memref<32x16xf32, #tpu.memory_space<vmem>>) attributes {dimension_semantics = [], scalar_prefetch = 0 : i64, scratch_operands = 1 : i64, tpu.core_type = #tpu.core_type<tc>} {
    %c0 = arith.constant 0 : index
    %c0_0 = arith.constant 0 : index
    %c0_1 = arith.constant 0 : index
    %0 = vector.load %arg1[%c0, %c0_0, %c0_1] : memref<3x8x16xf32, #tpu.memory_space<vmem>>, vector<1x8x16xf32>
    %1 = vector.shape_cast %0 : vector<1x8x16xf32> to vector<8x16xf32>
    %c1 = arith.constant 1 : index
    %c0_2 = arith.constant 0 : index
    %c0_3 = arith.constant 0 : index
    %2 = vector.load %arg1[%c1, %c0_2, %c0_3] : memref<3x8x16xf32, #tpu.memory_space<vmem>>, vector<1x8x16xf32>
    %3 = vector.shape_cast %2 : vector<1x8x16xf32> to vector<8x16xf32>
    %c2 = arith.constant 2 : index
    %c0_4 = arith.constant 0 : index
    %c0_5 = arith.constant 0 : index
    %4 = vector.load %arg1[%c2, %c0_4, %c0_5] : memref<3x8x16xf32, #tpu.memory_space<vmem>>, vector<1x8x16xf32>
    %5 = vector.shape_cast %4 : vector<1x8x16xf32> to vector<8x16xf32>
    %c0_6 = arith.constant 0 : index
    %c0_7 = arith.constant 0 : index
    %c0_8 = arith.constant 0 : index
    %6 = vector.load %arg2[%c0_6, %c0_7, %c0_8] : memref<3x16x64xf32, #tpu.memory_space<vmem>>, vector<1x16x64xf32>
    %7 = vector.shape_cast %6 : vector<1x16x64xf32> to vector<16x64xf32>
    %c1_9 = arith.constant 1 : index
    %c0_10 = arith.constant 0 : index
    %c0_11 = arith.constant 0 : index
    %8 = vector.load %arg2[%c1_9, %c0_10, %c0_11] : memref<3x16x64xf32, #tpu.memory_space<vmem>>, vector<1x16x64xf32>
    %9 = vector.shape_cast %8 : vector<1x16x64xf32> to vector<16x64xf32>
    %c2_12 = arith.constant 2 : index
    %c0_13 = arith.constant 0 : index
    %c0_14 = arith.constant 0 : index
    %10 = vector.load %arg2[%c2_12, %c0_13, %c0_14] : memref<3x16x64xf32, #tpu.memory_space<vmem>>, vector<1x16x64xf32>
    %11 = vector.shape_cast %10 : vector<1x16x64xf32> to vector<16x64xf32>
    %c0_15 = arith.constant 0 : index
    %c0_16 = arith.constant 0 : index
    %c0_17 = arith.constant 0 : index
    %12 = vector.load %arg5[%c0_15, %c0_16, %c0_17] : memref<3x4x8xf32, #tpu.memory_space<vmem>>, vector<1x4x8xf32>
    %13 = vector.shape_cast %12 : vector<1x4x8xf32> to vector<4x8xf32>
    %c1_18 = arith.constant 1 : index
    %c0_19 = arith.constant 0 : index
    %c0_20 = arith.constant 0 : index
    %14 = vector.load %arg5[%c1_18, %c0_19, %c0_20] : memref<3x4x8xf32, #tpu.memory_space<vmem>>, vector<1x4x8xf32>
    %15 = vector.shape_cast %14 : vector<1x4x8xf32> to vector<4x8xf32>
    %c2_21 = arith.constant 2 : index
    %c0_22 = arith.constant 0 : index
    %c0_23 = arith.constant 0 : index
    %16 = vector.load %arg5[%c2_21, %c0_22, %c0_23] : memref<3x4x8xf32, #tpu.memory_space<vmem>>, vector<1x4x8xf32>
    %17 = vector.shape_cast %16 : vector<1x4x8xf32> to vector<4x8xf32>
    %c0_24 = arith.constant 0 : index
    %c0_25 = arith.constant 0 : index
    %c0_26 = arith.constant 0 : index
    %18 = vector.load %arg6[%c0_24, %c0_25, %c0_26] : memref<3x64x64xf32, #tpu.memory_space<vmem>>, vector<1x64x64xf32>
    %19 = vector.shape_cast %18 : vector<1x64x64xf32> to vector<64x64xf32>
    %c1_27 = arith.constant 1 : index
    %c0_28 = arith.constant 0 : index
    %c0_29 = arith.constant 0 : index
    %20 = vector.load %arg6[%c1_27, %c0_28, %c0_29] : memref<3x64x64xf32, #tpu.memory_space<vmem>>, vector<1x64x64xf32>
    %21 = vector.shape_cast %20 : vector<1x64x64xf32> to vector<64x64xf32>
    %c2_30 = arith.constant 2 : index
    %c0_31 = arith.constant 0 : index
    %c0_32 = arith.constant 0 : index
    %22 = vector.load %arg6[%c2_30, %c0_31, %c0_32] : memref<3x64x64xf32, #tpu.memory_space<vmem>>, vector<1x64x64xf32>
    %23 = vector.shape_cast %22 : vector<1x64x64xf32> to vector<64x64xf32>
    %c0_33 = arith.constant 0 : index
    %c0_34 = arith.constant 0 : index
    %c0_35 = arith.constant 0 : index
    %24 = vector.load %arg9[%c0_33, %c0_34, %c0_35] : memref<3x4x4xf32, #tpu.memory_space<vmem>>, vector<1x4x4xf32>
    %25 = vector.shape_cast %24 : vector<1x4x4xf32> to vector<4x4xf32>
    %c1_36 = arith.constant 1 : index
    %c0_37 = arith.constant 0 : index
    %c0_38 = arith.constant 0 : index
    %26 = vector.load %arg9[%c1_36, %c0_37, %c0_38] : memref<3x4x4xf32, #tpu.memory_space<vmem>>, vector<1x4x4xf32>
    %27 = vector.shape_cast %26 : vector<1x4x4xf32> to vector<4x4xf32>
    %c2_39 = arith.constant 2 : index
    %c0_40 = arith.constant 0 : index
    %c0_41 = arith.constant 0 : index
    %28 = vector.load %arg9[%c2_39, %c0_40, %c0_41] : memref<3x4x4xf32, #tpu.memory_space<vmem>>, vector<1x4x4xf32>
    %29 = vector.shape_cast %28 : vector<1x4x4xf32> to vector<4x4xf32>
    %c0_42 = arith.constant 0 : index
    %c0_43 = arith.constant 0 : index
    %c0_44 = arith.constant 0 : index
    %30 = vector.load %arg10[%c0_42, %c0_43, %c0_44] : memref<3x64x64xf32, #tpu.memory_space<vmem>>, vector<1x64x64xf32>
    %31 = vector.shape_cast %30 : vector<1x64x64xf32> to vector<64x64xf32>
    %c1_45 = arith.constant 1 : index
    %c0_46 = arith.constant 0 : index
    %c0_47 = arith.constant 0 : index
    %32 = vector.load %arg10[%c1_45, %c0_46, %c0_47] : memref<3x64x64xf32, #tpu.memory_space<vmem>>, vector<1x64x64xf32>
    %33 = vector.shape_cast %32 : vector<1x64x64xf32> to vector<64x64xf32>
    %c2_48 = arith.constant 2 : index
    %c0_49 = arith.constant 0 : index
    %c0_50 = arith.constant 0 : index
    %34 = vector.load %arg10[%c2_48, %c0_49, %c0_50] : memref<3x64x64xf32, #tpu.memory_space<vmem>>, vector<1x64x64xf32>
    %35 = vector.shape_cast %34 : vector<1x64x64xf32> to vector<64x64xf32>
    %c0_51 = arith.constant 0 : index
    %c0_52 = arith.constant 0 : index
    %36 = vector.load %arg3[%c0_51, %c0_52] : memref<1x64xf32, #tpu.memory_space<vmem>>, vector<1x64xf32>
    %c0_53 = arith.constant 0 : index
    %c0_54 = arith.constant 0 : index
    %37 = vector.load %arg4[%c0_53, %c0_54] : memref<1x64xf32, #tpu.memory_space<vmem>>, vector<1x64xf32>
    %c0_55 = arith.constant 0 : index
    %c0_56 = arith.constant 0 : index
    %38 = vector.load %arg7[%c0_55, %c0_56] : memref<1x64xf32, #tpu.memory_space<vmem>>, vector<1x64xf32>
    %c0_57 = arith.constant 0 : index
    %c0_58 = arith.constant 0 : index
    %39 = vector.load %arg8[%c0_57, %c0_58] : memref<1x64xf32, #tpu.memory_space<vmem>>, vector<1x64xf32>
    %c0_59 = arith.constant 0 : index
    %c0_60 = arith.constant 0 : index
    %40 = vector.load %arg11[%c0_59, %c0_60] : memref<1x64xf32, #tpu.memory_space<vmem>>, vector<1x64xf32>
    %c0_61 = arith.constant 0 : index
    %c0_62 = arith.constant 0 : index
    %c0_63 = arith.constant 0 : index
    %c0_64 = arith.constant 0 : index
    %41 = vector.load %arg0[%c0_61, %c0_62, %c0_63, %c0_64] : memref<2x4x16x16xf32, #tpu.memory_space<vmem>>, vector<1x4x16x16xf32>
    %42 = vector.shape_cast %41 : vector<1x4x16x16xf32> to vector<4x16x16xf32>
    %cst = arith.constant dense<0xFF800000> : vector<16x16xf32>
    %43 = vector.multi_reduction <maximumf>, %42, %cst [0] : vector<4x16x16xf32> to vector<16x16xf32>
    %cst_65 = arith.constant dense<0.000000e+00> : vector<8x16xf32>
    %44 = tpu.matmul %1, %43, %cst_65 {dimension_numbers = #tpu.dot_dimension_numbers<[1], [0], [0], [1], [0, 0, 1, 1], [], []>} : vector<8x16xf32>, vector<16x16xf32>, vector<8x16xf32> -> vector<8x16xf32>
    %cst_66 = arith.constant dense<0.000000e+00> : vector<8x64xf32>
    %45 = tpu.matmul %44, %7, %cst_66 {dimension_numbers = #tpu.dot_dimension_numbers<[1], [0], [0], [1], [0, 0, 1, 1], [], []>} : vector<8x16xf32>, vector<16x64xf32>, vector<8x64xf32> -> vector<8x64xf32>
    %cst_67 = arith.constant dense<0.000000e+00> : vector<8x16xf32>
    %46 = tpu.matmul %3, %43, %cst_67 {dimension_numbers = #tpu.dot_dimension_numbers<[1], [0], [0], [1], [0, 0, 1, 1], [], []>} : vector<8x16xf32>, vector<16x16xf32>, vector<8x16xf32> -> vector<8x16xf32>
    %cst_68 = arith.constant dense<0.000000e+00> : vector<8x64xf32>
    %47 = tpu.matmul %46, %9, %cst_68 {dimension_numbers = #tpu.dot_dimension_numbers<[1], [0], [0], [1], [0, 0, 1, 1], [], []>} : vector<8x16xf32>, vector<16x64xf32>, vector<8x64xf32> -> vector<8x64xf32>
    %48 = arith.addf %45, %47 : vector<8x64xf32>
    %cst_69 = arith.constant dense<0.000000e+00> : vector<8x16xf32>
    %49 = tpu.matmul %5, %43, %cst_69 {dimension_numbers = #tpu.dot_dimension_numbers<[1], [0], [0], [1], [0, 0, 1, 1], [], []>} : vector<8x16xf32>, vector<16x16xf32>, vector<8x16xf32> -> vector<8x16xf32>
    %cst_70 = arith.constant dense<0.000000e+00> : vector<8x64xf32>
    %50 = tpu.matmul %49, %11, %cst_70 {dimension_numbers = #tpu.dot_dimension_numbers<[1], [0], [0], [1], [0, 0, 1, 1], [], []>} : vector<8x16xf32>, vector<16x64xf32>, vector<8x64xf32> -> vector<8x64xf32>
    %51 = arith.addf %48, %50 : vector<8x64xf32>
    %52 = vector.broadcast %36 : vector<1x64xf32> to vector<8x64xf32>
    %53 = arith.mulf %51, %52 : vector<8x64xf32>
    %54 = vector.broadcast %37 : vector<1x64xf32> to vector<8x64xf32>
    %55 = arith.addf %53, %54 : vector<8x64xf32>
    %cst_71 = arith.constant 5.000000e-01 : f32
    %56 = vector.broadcast %cst_71 : f32 to vector<8x64xf32>
    %57 = arith.mulf %56, %55 : vector<8x64xf32>
    %cst_72 = arith.constant 0.707106769 : f32
    %58 = vector.broadcast %cst_72 : f32 to vector<8x64xf32>
    %59 = arith.mulf %55, %58 : vector<8x64xf32>
    %cst_73 = arith.constant 0.000000e+00 : f32
    %60 = vector.broadcast %cst_73 : f32 to vector<8x64xf32>
    %61 = arith.cmpf oge, %59, %60 : vector<8x64xf32>
    %cst_74 = arith.constant 1.000000e+00 : f32
    %cst_75 = arith.constant -1.000000e+00 : f32
    %62 = vector.broadcast %cst_74 : f32 to vector<8x64xf32>
    %63 = vector.broadcast %cst_75 : f32 to vector<8x64xf32>
    %64 = arith.select %61, %62, %63 : vector<8x64xi1>, vector<8x64xf32>
    %65 = math.absf %59 : vector<8x64xf32>
    %cst_76 = arith.constant 0.327591091 : f32
    %66 = vector.broadcast %cst_76 : f32 to vector<8x64xf32>
    %67 = arith.mulf %66, %65 : vector<8x64xf32>
    %cst_77 = arith.constant 1.000000e+00 : f32
    %68 = vector.broadcast %cst_77 : f32 to vector<8x64xf32>
    %69 = arith.addf %68, %67 : vector<8x64xf32>
    %cst_78 = arith.constant 1.000000e+00 : f32
    %70 = vector.broadcast %cst_78 : f32 to vector<8x64xf32>
    %71 = arith.divf %70, %69 : vector<8x64xf32>
    %cst_79 = arith.constant 1.06140542 : f32
    %72 = vector.broadcast %cst_79 : f32 to vector<8x64xf32>
    %73 = arith.mulf %72, %71 : vector<8x64xf32>
    %cst_80 = arith.constant -1.45315206 : f32
    %74 = vector.broadcast %cst_80 : f32 to vector<8x64xf32>
    %75 = arith.addf %73, %74 : vector<8x64xf32>
    %76 = arith.mulf %75, %71 : vector<8x64xf32>
    %cst_81 = arith.constant 1.42141378 : f32
    %77 = vector.broadcast %cst_81 : f32 to vector<8x64xf32>
    %78 = arith.addf %76, %77 : vector<8x64xf32>
    %79 = arith.mulf %78, %71 : vector<8x64xf32>
    %cst_82 = arith.constant -0.284496725 : f32
    %80 = vector.broadcast %cst_82 : f32 to vector<8x64xf32>
    %81 = arith.addf %79, %80 : vector<8x64xf32>
    %82 = arith.mulf %81, %71 : vector<8x64xf32>
    %cst_83 = arith.constant 0.254829586 : f32
    %83 = vector.broadcast %cst_83 : f32 to vector<8x64xf32>
    %84 = arith.addf %82, %83 : vector<8x64xf32>
    %85 = arith.mulf %84, %71 : vector<8x64xf32>
    %cst_84 = arith.constant 0.000000e+00 : f32
    %86 = vector.broadcast %cst_84 : f32 to vector<8x64xf32>
    %87 = arith.subf %86, %65 : vector<8x64xf32>
    %88 = arith.mulf %87, %65 : vector<8x64xf32>
    %89 = math.exp %88 : vector<8x64xf32>
    %90 = arith.mulf %85, %89 : vector<8x64xf32>
    %cst_85 = arith.constant 1.000000e+00 : f32
    %91 = vector.broadcast %cst_85 : f32 to vector<8x64xf32>
    %92 = arith.subf %91, %90 : vector<8x64xf32>
    %93 = arith.mulf %64, %92 : vector<8x64xf32>
    %cst_86 = arith.constant 1.000000e+00 : f32
    %94 = vector.broadcast %cst_86 : f32 to vector<8x64xf32>
    %95 = arith.addf %94, %93 : vector<8x64xf32>
    %96 = arith.mulf %57, %95 : vector<8x64xf32>
    %cst_87 = arith.constant dense<0.000000e+00> : vector<4x64xf32>
    %97 = tpu.matmul %13, %96, %cst_87 {dimension_numbers = #tpu.dot_dimension_numbers<[1], [0], [0], [1], [0, 0, 1, 1], [], []>} : vector<4x8xf32>, vector<8x64xf32>, vector<4x64xf32> -> vector<4x64xf32>
    %cst_88 = arith.constant dense<0.000000e+00> : vector<4x64xf32>
    %98 = tpu.matmul %97, %19, %cst_88 {dimension_numbers = #tpu.dot_dimension_numbers<[1], [0], [0], [1], [0, 0, 1, 1], [], []>} : vector<4x64xf32>, vector<64x64xf32>, vector<4x64xf32> -> vector<4x64xf32>
    %cst_89 = arith.constant dense<0.000000e+00> : vector<4x64xf32>
    %99 = tpu.matmul %15, %96, %cst_89 {dimension_numbers = #tpu.dot_dimension_numbers<[1], [0], [0], [1], [0, 0, 1, 1], [], []>} : vector<4x8xf32>, vector<8x64xf32>, vector<4x64xf32> -> vector<4x64xf32>
    %cst_90 = arith.constant dense<0.000000e+00> : vector<4x64xf32>
    %100 = tpu.matmul %99, %21, %cst_90 {dimension_numbers = #tpu.dot_dimension_numbers<[1], [0], [0], [1], [0, 0, 1, 1], [], []>} : vector<4x64xf32>, vector<64x64xf32>, vector<4x64xf32> -> vector<4x64xf32>
    %101 = arith.addf %98, %100 : vector<4x64xf32>
    %cst_91 = arith.constant dense<0.000000e+00> : vector<4x64xf32>
    %102 = tpu.matmul %17, %96, %cst_91 {dimension_numbers = #tpu.dot_dimension_numbers<[1], [0], [0], [1], [0, 0, 1, 1], [], []>} : vector<4x8xf32>, vector<8x64xf32>, vector<4x64xf32> -> vector<4x64xf32>
    %cst_92 = arith.constant dense<0.000000e+00> : vector<4x64xf32>
    %103 = tpu.matmul %102, %23, %cst_92 {dimension_numbers = #tpu.dot_dimension_numbers<[1], [0], [0], [1], [0, 0, 1, 1], [], []>} : vector<4x64xf32>, vector<64x64xf32>, vector<4x64xf32> -> vector<4x64xf32>
    %104 = arith.addf %101, %103 : vector<4x64xf32>
    %105 = vector.broadcast %38 : vector<1x64xf32> to vector<4x64xf32>
    %106 = arith.mulf %104, %105 : vector<4x64xf32>
    %107 = vector.broadcast %39 : vector<1x64xf32> to vector<4x64xf32>
    %108 = arith.addf %106, %107 : vector<4x64xf32>
    %109 = vector.broadcast %40 : vector<1x64xf32> to vector<4x64xf32>
    %110 = arith.addf %108, %109 : vector<4x64xf32>
    %cst_93 = arith.constant dense<0.000000e+00> : vector<4x64xf32>
    %111 = tpu.matmul %25, %108, %cst_93 {dimension_numbers = #tpu.dot_dimension_numbers<[1], [0], [0], [1], [0, 0, 1, 1], [], []>} : vector<4x4xf32>, vector<4x64xf32>, vector<4x64xf32> -> vector<4x64xf32>
    %cst_94 = arith.constant dense<0.000000e+00> : vector<4x64xf32>
    %112 = tpu.matmul %111, %31, %cst_94 {dimension_numbers = #tpu.dot_dimension_numbers<[1], [0], [0], [1], [0, 0, 1, 1], [], []>} : vector<4x64xf32>, vector<64x64xf32>, vector<4x64xf32> -> vector<4x64xf32>
    %cst_95 = arith.constant dense<0.000000e+00> : vector<4x64xf32>
    %113 = tpu.matmul %27, %108, %cst_95 {dimension_numbers = #tpu.dot_dimension_numbers<[1], [0], [0], [1], [0, 0, 1, 1], [], []>} : vector<4x4xf32>, vector<4x64xf32>, vector<4x64xf32> -> vector<4x64xf32>
    %cst_96 = arith.constant dense<0.000000e+00> : vector<4x64xf32>
    %114 = tpu.matmul %113, %33, %cst_96 {dimension_numbers = #tpu.dot_dimension_numbers<[1], [0], [0], [1], [0, 0, 1, 1], [], []>} : vector<4x64xf32>, vector<64x64xf32>, vector<4x64xf32> -> vector<4x64xf32>
    %115 = arith.addf %112, %114 : vector<4x64xf32>
    %cst_97 = arith.constant dense<0.000000e+00> : vector<4x64xf32>
    %116 = tpu.matmul %29, %108, %cst_97 {dimension_numbers = #tpu.dot_dimension_numbers<[1], [0], [0], [1], [0, 0, 1, 1], [], []>} : vector<4x4xf32>, vector<4x64xf32>, vector<4x64xf32> -> vector<4x64xf32>
    %cst_98 = arith.constant dense<0.000000e+00> : vector<4x64xf32>
    %117 = tpu.matmul %116, %35, %cst_98 {dimension_numbers = #tpu.dot_dimension_numbers<[1], [0], [0], [1], [0, 0, 1, 1], [], []>} : vector<4x64xf32>, vector<64x64xf32>, vector<4x64xf32> -> vector<4x64xf32>
    %118 = arith.addf %115, %117 : vector<4x64xf32>
    %119 = arith.addf %110, %118 : vector<4x64xf32>
    %120 = vector.extract_strided_slice %119 {offsets = [0, 0], sizes = [1, 16], strides = [1, 1]} : vector<4x64xf32> to vector<1x16xf32>
    %c0_99 = arith.constant 0 : index
    %c0_100 = arith.constant 0 : index
    %121 = vector.load %arg23[%c0_99, %c0_100] : memref<32x16xf32, #tpu.memory_space<vmem>>, vector<1x16xf32>
    tpu.vector_store %arg23[%c0_99, %c0_100], %120 {strides = array<i32>} : memref<32x16xf32, #tpu.memory_space<vmem>>, vector<1x16xf32>,
    %122 = vector.extract_strided_slice %119 {offsets = [0, 16], sizes = [1, 16], strides = [1, 1]} : vector<4x64xf32> to vector<1x16xf32>
    %c1_101 = arith.constant 1 : index
    %c0_102 = arith.constant 0 : index
    %123 = vector.load %arg23[%c1_101, %c0_102] : memref<32x16xf32, #tpu.memory_space<vmem>>, vector<1x16xf32>
    tpu.vector_store %arg23[%c1_101, %c0_102], %122 {strides = array<i32>} : memref<32x16xf32, #tpu.memory_space<vmem>>, vector<1x16xf32>,
    %124 = vector.extract_strided_slice %119 {offsets = [0, 32], sizes = [1, 16], strides = [1, 1]} : vector<4x64xf32> to vector<1x16xf32>
    %c2_103 = arith.constant 2 : index
    %c0_104 = arith.constant 0 : index
    %125 = vector.load %arg23[%c2_103, %c0_104] : memref<32x16xf32, #tpu.memory_space<vmem>>, vector<1x16xf32>
    tpu.vector_store %arg23[%c2_103, %c0_104], %124 {strides = array<i32>} : memref<32x16xf32, #tpu.memory_space<vmem>>, vector<1x16xf32>,
    %126 = vector.extract_strided_slice %119 {offsets = [0, 48], sizes = [1, 16], strides = [1, 1]} : vector<4x64xf32> to vector<1x16xf32>
    %c3 = arith.constant 3 : index
    %c0_105 = arith.constant 0 : index
    %127 = vector.load %arg23[%c3, %c0_105] : memref<32x16xf32, #tpu.memory_space<vmem>>, vector<1x16xf32>
    tpu.vector_store %arg23[%c3, %c0_105], %126 {strides = array<i32>} : memref<32x16xf32, #tpu.memory_space<vmem>>, vector<1x16xf32>,
    %128 = vector.extract_strided_slice %119 {offsets = [1, 0], sizes = [1, 16], strides = [1, 1]} : vector<4x64xf32> to vector<1x16xf32>
    %c4 = arith.constant 4 : index
    %c0_106 = arith.constant 0 : index
    %129 = vector.load %arg23[%c4, %c0_106] : memref<32x16xf32, #tpu.memory_space<vmem>>, vector<1x16xf32>
    tpu.vector_store %arg23[%c4, %c0_106], %128 {strides = array<i32>} : memref<32x16xf32, #tpu.memory_space<vmem>>, vector<1x16xf32>,
    %130 = vector.extract_strided_slice %119 {offsets = [1, 16], sizes = [1, 16], strides = [1, 1]} : vector<4x64xf32> to vector<1x16xf32>
    %c5 = arith.constant 5 : index
    %c0_107 = arith.constant 0 : index
    %131 = vector.load %arg23[%c5, %c0_107] : memref<32x16xf32, #tpu.memory_space<vmem>>, vector<1x16xf32>
    tpu.vector_store %arg23[%c5, %c0_107], %130 {strides = array<i32>} : memref<32x16xf32, #tpu.memory_space<vmem>>, vector<1x16xf32>,
    %132 = vector.extract_strided_slice %119 {offsets = [1, 32], sizes = [1, 16], strides = [1, 1]} : vector<4x64xf32> to vector<1x16xf32>
    %c6 = arith.constant 6 : index
    %c0_108 = arith.constant 0 : index
    %133 = vector.load %arg23[%c6, %c0_108] : memref<32x16xf32, #tpu.memory_space<vmem>>, vector<1x16xf32>
    tpu.vector_store %arg23[%c6, %c0_108], %132 {strides = array<i32>} : memref<32x16xf32, #tpu.memory_space<vmem>>, vector<1x16xf32>,
    %134 = vector.extract_strided_slice %119 {offsets = [1, 48], sizes = [1, 16], strides = [1, 1]} : vector<4x64xf32> to vector<1x16xf32>
    %c7 = arith.constant 7 : index
    %c0_109 = arith.constant 0 : index
    %135 = vector.load %arg23[%c7, %c0_109] : memref<32x16xf32, #tpu.memory_space<vmem>>, vector<1x16xf32>
    tpu.vector_store %arg23[%c7, %c0_109], %134 {strides = array<i32>} : memref<32x16xf32, #tpu.memory_space<vmem>>, vector<1x16xf32>,
    %136 = vector.extract_strided_slice %119 {offsets = [2, 0], sizes = [1, 16], strides = [1, 1]} : vector<4x64xf32> to vector<1x16xf32>
    %c8 = arith.constant 8 : index
    %c0_110 = arith.constant 0 : index
    %137 = vector.load %arg23[%c8, %c0_110] : memref<32x16xf32, #tpu.memory_space<vmem>>, vector<1x16xf32>
    tpu.vector_store %arg23[%c8, %c0_110], %136 {strides = array<i32>} : memref<32x16xf32, #tpu.memory_space<vmem>>, vector<1x16xf32>,
    %138 = vector.extract_strided_slice %119 {offsets = [2, 16], sizes = [1, 16], strides = [1, 1]} : vector<4x64xf32> to vector<1x16xf32>
    %c9 = arith.constant 9 : index
    %c0_111 = arith.constant 0 : index
    %139 = vector.load %arg23[%c9, %c0_111] : memref<32x16xf32, #tpu.memory_space<vmem>>, vector<1x16xf32>
    tpu.vector_store %arg23[%c9, %c0_111], %138 {strides = array<i32>} : memref<32x16xf32, #tpu.memory_space<vmem>>, vector<1x16xf32>,
    %140 = vector.extract_strided_slice %119 {offsets = [2, 32], sizes = [1, 16], strides = [1, 1]} : vector<4x64xf32> to vector<1x16xf32>
    %c10 = arith.constant 10 : index
    %c0_112 = arith.constant 0 : index
    %141 = vector.load %arg23[%c10, %c0_112] : memref<32x16xf32, #tpu.memory_space<vmem>>, vector<1x16xf32>
    tpu.vector_store %arg23[%c10, %c0_112], %140 {strides = array<i32>} : memref<32x16xf32, #tpu.memory_space<vmem>>, vector<1x16xf32>,
    %142 = vector.extract_strided_slice %119 {offsets = [2, 48], sizes = [1, 16], strides = [1, 1]} : vector<4x64xf32> to vector<1x16xf32>
    %c11 = arith.constant 11 : index
    %c0_113 = arith.constant 0 : index
    %143 = vector.load %arg23[%c11, %c0_113] : memref<32x16xf32, #tpu.memory_space<vmem>>, vector<1x16xf32>
    tpu.vector_store %arg23[%c11, %c0_113], %142 {strides = array<i32>} : memref<32x16xf32, #tpu.memory_space<vmem>>, vector<1x16xf32>,
    %144 = vector.extract_strided_slice %119 {offsets = [3, 0], sizes = [1, 16], strides = [1, 1]} : vector<4x64xf32> to vector<1x16xf32>
    %c12 = arith.constant 12 : index
    %c0_114 = arith.constant 0 : index
    %145 = vector.load %arg23[%c12, %c0_114] : memref<32x16xf32, #tpu.memory_space<vmem>>, vector<1x16xf32>
    tpu.vector_store %arg23[%c12, %c0_114], %144 {strides = array<i32>} : memref<32x16xf32, #tpu.memory_space<vmem>>, vector<1x16xf32>,
    %146 = vector.extract_strided_slice %119 {offsets = [3, 16], sizes = [1, 16], strides = [1, 1]} : vector<4x64xf32> to vector<1x16xf32>
    %c13 = arith.constant 13 : index
    %c0_115 = arith.constant 0 : index
    %147 = vector.load %arg23[%c13, %c0_115] : memref<32x16xf32, #tpu.memory_space<vmem>>, vector<1x16xf32>
    tpu.vector_store %arg23[%c13, %c0_115], %146 {strides = array<i32>} : memref<32x16xf32, #tpu.memory_space<vmem>>, vector<1x16xf32>,
    %148 = vector.extract_strided_slice %119 {offsets = [3, 32], sizes = [1, 16], strides = [1, 1]} : vector<4x64xf32> to vector<1x16xf32>
    %c14 = arith.constant 14 : index
    %c0_116 = arith.constant 0 : index
    %149 = vector.load %arg23[%c14, %c0_116] : memref<32x16xf32, #tpu.memory_space<vmem>>, vector<1x16xf32>
    tpu.vector_store %arg23[%c14, %c0_116], %148 {strides = array<i32>} : memref<32x16xf32, #tpu.memory_space<vmem>>, vector<1x16xf32>,
    %150 = vector.extract_strided_slice %119 {offsets = [3, 48], sizes = [1, 16], strides = [1, 1]} : vector<4x64xf32> to vector<1x16xf32>
    %c15 = arith.constant 15 : index
    %c0_117 = arith.constant 0 : index
    %151 = vector.load %arg23[%c15, %c0_117] : memref<32x16xf32, #tpu.memory_space<vmem>>, vector<1x16xf32>
    tpu.vector_store %arg23[%c15, %c0_117], %150 {strides = array<i32>} : memref<32x16xf32, #tpu.memory_space<vmem>>, vector<1x16xf32>,
    %c1_118 = arith.constant 1 : index
    %c0_119 = arith.constant 0 : index
    %c0_120 = arith.constant 0 : index
    %c0_121 = arith.constant 0 : index
    %152 = vector.load %arg0[%c1_118, %c0_119, %c0_120, %c0_121] : memref<2x4x16x16xf32, #tpu.memory_space<vmem>>, vector<1x4x16x16xf32>
    %153 = vector.shape_cast %152 : vector<1x4x16x16xf32> to vector<4x16x16xf32>
    %cst_122 = arith.constant dense<0xFF800000> : vector<16x16xf32>
    %154 = vector.multi_reduction <maximumf>, %153, %cst_122 [0] : vector<4x16x16xf32> to vector<16x16xf32>
    %cst_123 = arith.constant dense<0.000000e+00> : vector<8x16xf32>
    %155 = tpu.matmul %1, %154, %cst_123 {dimension_numbers = #tpu.dot_dimension_numbers<[1], [0], [0], [1], [0, 0, 1, 1], [], []>} : vector<8x16xf32>, vector<16x16xf32>, vector<8x16xf32> -> vector<8x16xf32>
    %cst_124 = arith.constant dense<0.000000e+00> : vector<8x64xf32>
    %156 = tpu.matmul %155, %7, %cst_124 {dimension_numbers = #tpu.dot_dimension_numbers<[1], [0], [0], [1], [0, 0, 1, 1], [], []>} : vector<8x16xf32>, vector<16x64xf32>, vector<8x64xf32> -> vector<8x64xf32>
    %cst_125 = arith.constant dense<0.000000e+00> : vector<8x16xf32>
    %157 = tpu.matmul %3, %154, %cst_125 {dimension_numbers = #tpu.dot_dimension_numbers<[1], [0], [0], [1], [0, 0, 1, 1], [], []>} : vector<8x16xf32>, vector<16x16xf32>, vector<8x16xf32> -> vector<8x16xf32>
    %cst_126 = arith.constant dense<0.000000e+00> : vector<8x64xf32>
    %158 = tpu.matmul %157, %9, %cst_126 {dimension_numbers = #tpu.dot_dimension_numbers<[1], [0], [0], [1], [0, 0, 1, 1], [], []>} : vector<8x16xf32>, vector<16x64xf32>, vector<8x64xf32> -> vector<8x64xf32>
    %159 = arith.addf %156, %158 : vector<8x64xf32>
    %cst_127 = arith.constant dense<0.000000e+00> : vector<8x16xf32>
    %160 = tpu.matmul %5, %154, %cst_127 {dimension_numbers = #tpu.dot_dimension_numbers<[1], [0], [0], [1], [0, 0, 1, 1], [], []>} : vector<8x16xf32>, vector<16x16xf32>, vector<8x16xf32> -> vector<8x16xf32>
    %cst_128 = arith.constant dense<0.000000e+00> : vector<8x64xf32>
    %161 = tpu.matmul %160, %11, %cst_128 {dimension_numbers = #tpu.dot_dimension_numbers<[1], [0], [0], [1], [0, 0, 1, 1], [], []>} : vector<8x16xf32>, vector<16x64xf32>, vector<8x64xf32> -> vector<8x64xf32>
    %162 = arith.addf %159, %161 : vector<8x64xf32>
    %163 = vector.broadcast %36 : vector<1x64xf32> to vector<8x64xf32>
    %164 = arith.mulf %162, %163 : vector<8x64xf32>
    %165 = vector.broadcast %37 : vector<1x64xf32> to vector<8x64xf32>
    %166 = arith.addf %164, %165 : vector<8x64xf32>
    %cst_129 = arith.constant 5.000000e-01 : f32
    %167 = vector.broadcast %cst_129 : f32 to vector<8x64xf32>
    %168 = arith.mulf %167, %166 : vector<8x64xf32>
    %cst_130 = arith.constant 0.707106769 : f32
    %169 = vector.broadcast %cst_130 : f32 to vector<8x64xf32>
    %170 = arith.mulf %166, %169 : vector<8x64xf32>
    %cst_131 = arith.constant 0.000000e+00 : f32
    %171 = vector.broadcast %cst_131 : f32 to vector<8x64xf32>
    %172 = arith.cmpf oge, %170, %171 : vector<8x64xf32>
    %cst_132 = arith.constant 1.000000e+00 : f32
    %cst_133 = arith.constant -1.000000e+00 : f32
    %173 = vector.broadcast %cst_132 : f32 to vector<8x64xf32>
    %174 = vector.broadcast %cst_133 : f32 to vector<8x64xf32>
    %175 = arith.select %172, %173, %174 : vector<8x64xi1>, vector<8x64xf32>
    %176 = math.absf %170 : vector<8x64xf32>
    %cst_134 = arith.constant 0.327591091 : f32
    %177 = vector.broadcast %cst_134 : f32 to vector<8x64xf32>
    %178 = arith.mulf %177, %176 : vector<8x64xf32>
    %cst_135 = arith.constant 1.000000e+00 : f32
    %179 = vector.broadcast %cst_135 : f32 to vector<8x64xf32>
    %180 = arith.addf %179, %178 : vector<8x64xf32>
    %cst_136 = arith.constant 1.000000e+00 : f32
    %181 = vector.broadcast %cst_136 : f32 to vector<8x64xf32>
    %182 = arith.divf %181, %180 : vector<8x64xf32>
    %cst_137 = arith.constant 1.06140542 : f32
    %183 = vector.broadcast %cst_137 : f32 to vector<8x64xf32>
    %184 = arith.mulf %183, %182 : vector<8x64xf32>
    %cst_138 = arith.constant -1.45315206 : f32
    %185 = vector.broadcast %cst_138 : f32 to vector<8x64xf32>
    %186 = arith.addf %184, %185 : vector<8x64xf32>
    %187 = arith.mulf %186, %182 : vector<8x64xf32>
    %cst_139 = arith.constant 1.42141378 : f32
    %188 = vector.broadcast %cst_139 : f32 to vector<8x64xf32>
    %189 = arith.addf %187, %188 : vector<8x64xf32>
    %190 = arith.mulf %189, %182 : vector<8x64xf32>
    %cst_140 = arith.constant -0.284496725 : f32
    %191 = vector.broadcast %cst_140 : f32 to vector<8x64xf32>
    %192 = arith.addf %190, %191 : vector<8x64xf32>
    %193 = arith.mulf %192, %182 : vector<8x64xf32>
    %cst_141 = arith.constant 0.254829586 : f32
    %194 = vector.broadcast %cst_141 : f32 to vector<8x64xf32>
    %195 = arith.addf %193, %194 : vector<8x64xf32>
    %196 = arith.mulf %195, %182 : vector<8x64xf32>
    %cst_142 = arith.constant 0.000000e+00 : f32
    %197 = vector.broadcast %cst_142 : f32 to vector<8x64xf32>
    %198 = arith.subf %197, %176 : vector<8x64xf32>
    %199 = arith.mulf %198, %176 : vector<8x64xf32>
    %200 = math.exp %199 : vector<8x64xf32>
    %201 = arith.mulf %196, %200 : vector<8x64xf32>
    %cst_143 = arith.constant 1.000000e+00 : f32
    %202 = vector.broadcast %cst_143 : f32 to vector<8x64xf32>
    %203 = arith.subf %202, %201 : vector<8x64xf32>
    %204 = arith.mulf %175, %203 : vector<8x64xf32>
    %cst_144 = arith.constant 1.000000e+00 : f32
    %205 = vector.broadcast %cst_144 : f32 to vector<8x64xf32>
    %206 = arith.addf %205, %204 : vector<8x64xf32>
    %207 = arith.mulf %168, %206 : vector<8x64xf32>
    %cst_145 = arith.constant dense<0.000000e+00> : vector<4x64xf32>
    %208 = tpu.matmul %13, %207, %cst_145 {dimension_numbers = #tpu.dot_dimension_numbers<[1], [0], [0], [1], [0, 0, 1, 1], [], []>} : vector<4x8xf32>, vector<8x64xf32>, vector<4x64xf32> -> vector<4x64xf32>
    %cst_146 = arith.constant dense<0.000000e+00> : vector<4x64xf32>
    %209 = tpu.matmul %208, %19, %cst_146 {dimension_numbers = #tpu.dot_dimension_numbers<[1], [0], [0], [1], [0, 0, 1, 1], [], []>} : vector<4x64xf32>, vector<64x64xf32>, vector<4x64xf32> -> vector<4x64xf32>
    %cst_147 = arith.constant dense<0.000000e+00> : vector<4x64xf32>
    %210 = tpu.matmul %15, %207, %cst_147 {dimension_numbers = #tpu.dot_dimension_numbers<[1], [0], [0], [1], [0, 0, 1, 1], [], []>} : vector<4x8xf32>, vector<8x64xf32>, vector<4x64xf32> -> vector<4x64xf32>
    %cst_148 = arith.constant dense<0.000000e+00> : vector<4x64xf32>
    %211 = tpu.matmul %210, %21, %cst_148 {dimension_numbers = #tpu.dot_dimension_numbers<[1], [0], [0], [1], [0, 0, 1, 1], [], []>} : vector<4x64xf32>, vector<64x64xf32>, vector<4x64xf32> -> vector<4x64xf32>
    %212 = arith.addf %209, %211 : vector<4x64xf32>
    %cst_149 = arith.constant dense<0.000000e+00> : vector<4x64xf32>
    %213 = tpu.matmul %17, %207, %cst_149 {dimension_numbers = #tpu.dot_dimension_numbers<[1], [0], [0], [1], [0, 0, 1, 1], [], []>} : vector<4x8xf32>, vector<8x64xf32>, vector<4x64xf32> -> vector<4x64xf32>
    %cst_150 = arith.constant dense<0.000000e+00> : vector<4x64xf32>
    %214 = tpu.matmul %213, %23, %cst_150 {dimension_numbers = #tpu.dot_dimension_numbers<[1], [0], [0], [1], [0, 0, 1, 1], [], []>} : vector<4x64xf32>, vector<64x64xf32>, vector<4x64xf32> -> vector<4x64xf32>
    %215 = arith.addf %212, %214 : vector<4x64xf32>
    %216 = vector.broadcast %38 : vector<1x64xf32> to vector<4x64xf32>
    %217 = arith.mulf %215, %216 : vector<4x64xf32>
    %218 = vector.broadcast %39 : vector<1x64xf32> to vector<4x64xf32>
    %219 = arith.addf %217, %218 : vector<4x64xf32>
    %220 = vector.broadcast %40 : vector<1x64xf32> to vector<4x64xf32>
    %221 = arith.addf %219, %220 : vector<4x64xf32>
    %cst_151 = arith.constant dense<0.000000e+00> : vector<4x64xf32>
    %222 = tpu.matmul %25, %219, %cst_151 {dimension_numbers = #tpu.dot_dimension_numbers<[1], [0], [0], [1], [0, 0, 1, 1], [], []>} : vector<4x4xf32>, vector<4x64xf32>, vector<4x64xf32> -> vector<4x64xf32>
    %cst_152 = arith.constant dense<0.000000e+00> : vector<4x64xf32>
    %223 = tpu.matmul %222, %31, %cst_152 {dimension_numbers = #tpu.dot_dimension_numbers<[1], [0], [0], [1], [0, 0, 1, 1], [], []>} : vector<4x64xf32>, vector<64x64xf32>, vector<4x64xf32> -> vector<4x64xf32>
    %cst_153 = arith.constant dense<0.000000e+00> : vector<4x64xf32>
    %224 = tpu.matmul %27, %219, %cst_153 {dimension_numbers = #tpu.dot_dimension_numbers<[1], [0], [0], [1], [0, 0, 1, 1], [], []>} : vector<4x4xf32>, vector<4x64xf32>, vector<4x64xf32> -> vector<4x64xf32>
    %cst_154 = arith.constant dense<0.000000e+00> : vector<4x64xf32>
    %225 = tpu.matmul %224, %33, %cst_154 {dimension_numbers = #tpu.dot_dimension_numbers<[1], [0], [0], [1], [0, 0, 1, 1], [], []>} : vector<4x64xf32>, vector<64x64xf32>, vector<4x64xf32> -> vector<4x64xf32>
    %226 = arith.addf %223, %225 : vector<4x64xf32>
    %cst_155 = arith.constant dense<0.000000e+00> : vector<4x64xf32>
    %227 = tpu.matmul %29, %219, %cst_155 {dimension_numbers = #tpu.dot_dimension_numbers<[1], [0], [0], [1], [0, 0, 1, 1], [], []>} : vector<4x4xf32>, vector<4x64xf32>, vector<4x64xf32> -> vector<4x64xf32>
    %cst_156 = arith.constant dense<0.000000e+00> : vector<4x64xf32>
    %228 = tpu.matmul %227, %35, %cst_156 {dimension_numbers = #tpu.dot_dimension_numbers<[1], [0], [0], [1], [0, 0, 1, 1], [], []>} : vector<4x64xf32>, vector<64x64xf32>, vector<4x64xf32> -> vector<4x64xf32>
    %229 = arith.addf %226, %228 : vector<4x64xf32>
    %230 = arith.addf %221, %229 : vector<4x64xf32>
    %231 = vector.extract_strided_slice %230 {offsets = [0, 0], sizes = [1, 16], strides = [1, 1]} : vector<4x64xf32> to vector<1x16xf32>
    %c16 = arith.constant 16 : index
    %c0_157 = arith.constant 0 : index
    %232 = vector.load %arg23[%c16, %c0_157] : memref<32x16xf32, #tpu.memory_space<vmem>>, vector<1x16xf32>
    tpu.vector_store %arg23[%c16, %c0_157], %231 {strides = array<i32>} : memref<32x16xf32, #tpu.memory_space<vmem>>, vector<1x16xf32>,
    %233 = vector.extract_strided_slice %230 {offsets = [0, 16], sizes = [1, 16], strides = [1, 1]} : vector<4x64xf32> to vector<1x16xf32>
    %c17 = arith.constant 17 : index
    %c0_158 = arith.constant 0 : index
    %234 = vector.load %arg23[%c17, %c0_158] : memref<32x16xf32, #tpu.memory_space<vmem>>, vector<1x16xf32>
    tpu.vector_store %arg23[%c17, %c0_158], %233 {strides = array<i32>} : memref<32x16xf32, #tpu.memory_space<vmem>>, vector<1x16xf32>,
    %235 = vector.extract_strided_slice %230 {offsets = [0, 32], sizes = [1, 16], strides = [1, 1]} : vector<4x64xf32> to vector<1x16xf32>
    %c18 = arith.constant 18 : index
    %c0_159 = arith.constant 0 : index
    %236 = vector.load %arg23[%c18, %c0_159] : memref<32x16xf32, #tpu.memory_space<vmem>>, vector<1x16xf32>
    tpu.vector_store %arg23[%c18, %c0_159], %235 {strides = array<i32>} : memref<32x16xf32, #tpu.memory_space<vmem>>, vector<1x16xf32>,
    %237 = vector.extract_strided_slice %230 {offsets = [0, 48], sizes = [1, 16], strides = [1, 1]} : vector<4x64xf32> to vector<1x16xf32>
    %c19 = arith.constant 19 : index
    %c0_160 = arith.constant 0 : index
    %238 = vector.load %arg23[%c19, %c0_160] : memref<32x16xf32, #tpu.memory_space<vmem>>, vector<1x16xf32>
    tpu.vector_store %arg23[%c19, %c0_160], %237 {strides = array<i32>} : memref<32x16xf32, #tpu.memory_space<vmem>>, vector<1x16xf32>,
    %239 = vector.extract_strided_slice %230 {offsets = [1, 0], sizes = [1, 16], strides = [1, 1]} : vector<4x64xf32> to vector<1x16xf32>
    %c20 = arith.constant 20 : index
    %c0_161 = arith.constant 0 : index
    %240 = vector.load %arg23[%c20, %c0_161] : memref<32x16xf32, #tpu.memory_space<vmem>>, vector<1x16xf32>
    tpu.vector_store %arg23[%c20, %c0_161], %239 {strides = array<i32>} : memref<32x16xf32, #tpu.memory_space<vmem>>, vector<1x16xf32>,
    %241 = vector.extract_strided_slice %230 {offsets = [1, 16], sizes = [1, 16], strides = [1, 1]} : vector<4x64xf32> to vector<1x16xf32>
    %c21 = arith.constant 21 : index
    %c0_162 = arith.constant 0 : index
    %242 = vector.load %arg23[%c21, %c0_162] : memref<32x16xf32, #tpu.memory_space<vmem>>, vector<1x16xf32>
    tpu.vector_store %arg23[%c21, %c0_162], %241 {strides = array<i32>} : memref<32x16xf32, #tpu.memory_space<vmem>>, vector<1x16xf32>,
    %243 = vector.extract_strided_slice %230 {offsets = [1, 32], sizes = [1, 16], strides = [1, 1]} : vector<4x64xf32> to vector<1x16xf32>
    %c22 = arith.constant 22 : index
    %c0_163 = arith.constant 0 : index
    %244 = vector.load %arg23[%c22, %c0_163] : memref<32x16xf32, #tpu.memory_space<vmem>>, vector<1x16xf32>
    tpu.vector_store %arg23[%c22, %c0_163], %243 {strides = array<i32>} : memref<32x16xf32, #tpu.memory_space<vmem>>, vector<1x16xf32>,
    %245 = vector.extract_strided_slice %230 {offsets = [1, 48], sizes = [1, 16], strides = [1, 1]} : vector<4x64xf32> to vector<1x16xf32>
    %c23 = arith.constant 23 : index
    %c0_164 = arith.constant 0 : index
    %246 = vector.load %arg23[%c23, %c0_164] : memref<32x16xf32, #tpu.memory_space<vmem>>, vector<1x16xf32>
    tpu.vector_store %arg23[%c23, %c0_164], %245 {strides = array<i32>} : memref<32x16xf32, #tpu.memory_space<vmem>>, vector<1x16xf32>,
    %247 = vector.extract_strided_slice %230 {offsets = [2, 0], sizes = [1, 16], strides = [1, 1]} : vector<4x64xf32> to vector<1x16xf32>
    %c24 = arith.constant 24 : index
    %c0_165 = arith.constant 0 : index
    %248 = vector.load %arg23[%c24, %c0_165] : memref<32x16xf32, #tpu.memory_space<vmem>>, vector<1x16xf32>
    tpu.vector_store %arg23[%c24, %c0_165], %247 {strides = array<i32>} : memref<32x16xf32, #tpu.memory_space<vmem>>, vector<1x16xf32>,
    %249 = vector.extract_strided_slice %230 {offsets = [2, 16], sizes = [1, 16], strides = [1, 1]} : vector<4x64xf32> to vector<1x16xf32>
    %c25 = arith.constant 25 : index
    %c0_166 = arith.constant 0 : index
    %250 = vector.load %arg23[%c25, %c0_166] : memref<32x16xf32, #tpu.memory_space<vmem>>, vector<1x16xf32>
    tpu.vector_store %arg23[%c25, %c0_166], %249 {strides = array<i32>} : memref<32x16xf32, #tpu.memory_space<vmem>>, vector<1x16xf32>,
    %251 = vector.extract_strided_slice %230 {offsets = [2, 32], sizes = [1, 16], strides = [1, 1]} : vector<4x64xf32> to vector<1x16xf32>
    %c26 = arith.constant 26 : index
    %c0_167 = arith.constant 0 : index
    %252 = vector.load %arg23[%c26, %c0_167] : memref<32x16xf32, #tpu.memory_space<vmem>>, vector<1x16xf32>
    tpu.vector_store %arg23[%c26, %c0_167], %251 {strides = array<i32>} : memref<32x16xf32, #tpu.memory_space<vmem>>, vector<1x16xf32>,
    %253 = vector.extract_strided_slice %230 {offsets = [2, 48], sizes = [1, 16], strides = [1, 1]} : vector<4x64xf32> to vector<1x16xf32>
    %c27 = arith.constant 27 : index
    %c0_168 = arith.constant 0 : index
    %254 = vector.load %arg23[%c27, %c0_168] : memref<32x16xf32, #tpu.memory_space<vmem>>, vector<1x16xf32>
    tpu.vector_store %arg23[%c27, %c0_168], %253 {strides = array<i32>} : memref<32x16xf32, #tpu.memory_space<vmem>>, vector<1x16xf32>,
    %255 = vector.extract_strided_slice %230 {offsets = [3, 0], sizes = [1, 16], strides = [1, 1]} : vector<4x64xf32> to vector<1x16xf32>
    %c28 = arith.constant 28 : index
    %c0_169 = arith.constant 0 : index
    %256 = vector.load %arg23[%c28, %c0_169] : memref<32x16xf32, #tpu.memory_space<vmem>>, vector<1x16xf32>
    tpu.vector_store %arg23[%c28, %c0_169], %255 {strides = array<i32>} : memref<32x16xf32, #tpu.memory_space<vmem>>, vector<1x16xf32>,
    %257 = vector.extract_strided_slice %230 {offsets = [3, 16], sizes = [1, 16], strides = [1, 1]} : vector<4x64xf32> to vector<1x16xf32>
    %c29 = arith.constant 29 : index
    %c0_170 = arith.constant 0 : index
    %258 = vector.load %arg23[%c29, %c0_170] : memref<32x16xf32, #tpu.memory_space<vmem>>, vector<1x16xf32>
    tpu.vector_store %arg23[%c29, %c0_170], %257 {strides = array<i32>} : memref<32x16xf32, #tpu.memory_space<vmem>>, vector<1x16xf32>,
    %259 = vector.extract_strided_slice %230 {offsets = [3, 32], sizes = [1, 16], strides = [1, 1]} : vector<4x64xf32> to vector<1x16xf32>
    %c30 = arith.constant 30 : index
    %c0_171 = arith.constant 0 : index
    %260 = vector.load %arg23[%c30, %c0_171] : memref<32x16xf32, #tpu.memory_space<vmem>>, vector<1x16xf32>
    tpu.vector_store %arg23[%c30, %c0_171], %259 {strides = array<i32>} : memref<32x16xf32, #tpu.memory_space<vmem>>, vector<1x16xf32>,
    %261 = vector.extract_strided_slice %230 {offsets = [3, 48], sizes = [1, 16], strides = [1, 1]} : vector<4x64xf32> to vector<1x16xf32>
    %c31 = arith.constant 31 : index
    %c0_172 = arith.constant 0 : index
    %262 = vector.load %arg23[%c31, %c0_172] : memref<32x16xf32, #tpu.memory_space<vmem>>, vector<1x16xf32>
    tpu.vector_store %arg23[%c31, %c0_172], %261 {strides = array<i32>} : memref<32x16xf32, #tpu.memory_space<vmem>>, vector<1x16xf32>,
    %c0_173 = arith.constant 0 : index
    %c0_174 = arith.constant 0 : index
    %263 = vector.load %arg12[%c0_173, %c0_174] : memref<1x16xf32, #tpu.memory_space<vmem>>, vector<1x16xf32>
    %c0_175 = arith.constant 0 : index
    %c0_176 = arith.constant 0 : index
    %264 = vector.load %arg13[%c0_175, %c0_176] : memref<1x16xf32, #tpu.memory_space<vmem>>, vector<1x16xf32>
    %c0_177 = arith.constant 0 : index
    %c0_178 = arith.constant 0 : index
    %265 = vector.load %arg18[%c0_177, %c0_178] : memref<1x16xf32, #tpu.memory_space<vmem>>, vector<1x16xf32>
    %c0_179 = arith.constant 0 : index
    %c0_180 = arith.constant 0 : index
    %266 = vector.load %arg19[%c0_179, %c0_180] : memref<1x16xf32, #tpu.memory_space<vmem>>, vector<1x16xf32>
    %c0_181 = arith.constant 0 : index
    %c0_182 = arith.constant 0 : index
    %267 = vector.load %arg14[%c0_181, %c0_182] : memref<3x16xf32, #tpu.memory_space<vmem>>, vector<3x16xf32>
    %c0_183 = arith.constant 0 : index
    %c0_184 = arith.constant 0 : index
    %268 = vector.load %arg15[%c0_183, %c0_184] : memref<16x32xf32, #tpu.memory_space<vmem>>, vector<16x32xf32>
    %c0_185 = arith.constant 0 : index
    %c0_186 = arith.constant 0 : index
    %269 = vector.load %arg16[%c0_185, %c0_186] : memref<16x16xf32, #tpu.memory_space<vmem>>, vector<16x16xf32>
    %c0_187 = arith.constant 0 : index
    %c0_188 = arith.constant 0 : index
    %270 = vector.load %arg17[%c0_187, %c0_188] : memref<1x16xf32, #tpu.memory_space<vmem>>, vector<1x16xf32>
    %c0_189 = arith.constant 0 : index
    %c0_190 = arith.constant 0 : index
    %271 = vector.load %arg20[%c0_189, %c0_190] : memref<3x16xf32, #tpu.memory_space<vmem>>, vector<3x16xf32>
    %c0_191 = arith.constant 0 : index
    %c0_192 = arith.constant 0 : index
    %272 = vector.load %arg21[%c0_191, %c0_192] : memref<3x1xf32, #tpu.memory_space<vmem>>, vector<3x1xf32>
    %c0_193 = arith.constant 0 : index
    %c0_194 = arith.constant 0 : index
    %273 = vector.load %arg23[%c0_193, %c0_194] : memref<32x16xf32, #tpu.memory_space<vmem>>, vector<16x16xf32>
    %cst_195 = arith.constant dense<0.000000e+00> : vector<16xf32>
    %274 = vector.multi_reduction <add>, %273, %cst_195 [1] : vector<16x16xf32> to vector<16xf32>
    %275 = vector.shape_cast %274 : vector<16xf32> to vector<16x1xf32>
    %cst_196 = arith.constant 1.600000e+01 : f32
    %276 = vector.broadcast %cst_196 : f32 to vector<16x1xf32>
    %277 = arith.divf %275, %276 : vector<16x1xf32>
    %278 = vector.broadcast %277 : vector<16x1xf32> to vector<16x16xf32>
    %279 = arith.subf %273, %278 : vector<16x16xf32>
    %280 = arith.mulf %279, %279 : vector<16x16xf32>
    %cst_197 = arith.constant dense<0.000000e+00> : vector<16xf32>
    %281 = vector.multi_reduction <add>, %280, %cst_197 [1] : vector<16x16xf32> to vector<16xf32>
    %282 = vector.shape_cast %281 : vector<16xf32> to vector<16x1xf32>
    %cst_198 = arith.constant 1.600000e+01 : f32
    %283 = vector.broadcast %cst_198 : f32 to vector<16x1xf32>
    %284 = arith.divf %282, %283 : vector<16x1xf32>
    %285 = vector.broadcast %277 : vector<16x1xf32> to vector<16x16xf32>
    %286 = arith.subf %273, %285 : vector<16x16xf32>
    %cst_199 = arith.constant 9.99999974E-6 : f32
    %287 = vector.broadcast %cst_199 : f32 to vector<16x1xf32>
    %288 = arith.addf %284, %287 : vector<16x1xf32>
    %289 = math.rsqrt %288 : vector<16x1xf32>
    %290 = vector.broadcast %289 : vector<16x1xf32> to vector<16x16xf32>
    %291 = arith.mulf %286, %290 : vector<16x16xf32>
    %292 = vector.broadcast %263 : vector<1x16xf32> to vector<16x16xf32>
    %293 = arith.mulf %291, %292 : vector<16x16xf32>
    %294 = vector.broadcast %264 : vector<1x16xf32> to vector<16x16xf32>
    %295 = arith.addf %293, %294 : vector<16x16xf32>
    %cst_200 = arith.constant dense<0.000000e+00> : vector<16x32xf32>
    %296 = tpu.matmul %295, %268, %cst_200 {dimension_numbers = #tpu.dot_dimension_numbers<[1], [0], [0], [1], [0, 0, 1, 1], [], []>} : vector<16x16xf32>, vector<16x32xf32>, vector<16x32xf32> -> vector<16x32xf32>
    %297 = vector.extract_strided_slice %296 {offsets = [0, 0], sizes = [16, 16], strides = [1, 1]} : vector<16x32xf32> to vector<16x16xf32>
    %298 = vector.extract_strided_slice %296 {offsets = [0, 16], sizes = [16, 16], strides = [1, 1]} : vector<16x32xf32> to vector<16x16xf32>
    %cst_201 = arith.constant dense<0.000000e+00> : vector<3x16xf32>
    %299 = tpu.matmul %267, %297, %cst_201 {dimension_numbers = #tpu.dot_dimension_numbers<[1], [1], [0], [0], [0, 0, 1, 0], [], []>} : vector<3x16xf32>, vector<16x16xf32>, vector<3x16xf32> -> vector<3x16xf32>
    %cst_202 = arith.constant 2.500000e-01 : f32
    %300 = vector.broadcast %cst_202 : f32 to vector<3x16xf32>
    %301 = arith.mulf %299, %300 : vector<3x16xf32>
    %cst_203 = arith.constant dense<0xFF800000> : vector<3xf32>
    %302 = vector.multi_reduction <maximumf>, %301, %cst_203 [1] : vector<3x16xf32> to vector<3xf32>
    %303 = vector.shape_cast %302 : vector<3xf32> to vector<3x1xf32>
    %304 = vector.broadcast %303 : vector<3x1xf32> to vector<3x16xf32>
    %305 = arith.subf %301, %304 : vector<3x16xf32>
    %306 = math.exp %305 : vector<3x16xf32>
    %cst_204 = arith.constant dense<0.000000e+00> : vector<3xf32>
    %307 = vector.multi_reduction <add>, %306, %cst_204 [1] : vector<3x16xf32> to vector<3xf32>
    %308 = vector.shape_cast %307 : vector<3xf32> to vector<3x1xf32>
    %309 = tpu.reciprocal %308 : vector<3x1xf32> -> vector<3x1xf32>
    %310 = vector.broadcast %309 : vector<3x1xf32> to vector<3x16xf32>
    %311 = arith.mulf %306, %310 : vector<3x16xf32>
    %cst_205 = arith.constant dense<0.000000e+00> : vector<3x16xf32>
    %312 = tpu.matmul %311, %298, %cst_205 {dimension_numbers = #tpu.dot_dimension_numbers<[1], [0], [0], [1], [0, 0, 1, 1], [], []>} : vector<3x16xf32>, vector<16x16xf32>, vector<3x16xf32> -> vector<3x16xf32>
    %cst_206 = arith.constant dense<0.000000e+00> : vector<3x16xf32>
    %313 = tpu.matmul %312, %269, %cst_206 {dimension_numbers = #tpu.dot_dimension_numbers<[1], [0], [0], [1], [0, 0, 1, 1], [], []>} : vector<3x16xf32>, vector<16x16xf32>, vector<3x16xf32> -> vector<3x16xf32>
    %314 = vector.broadcast %270 : vector<1x16xf32> to vector<3x16xf32>
    %315 = arith.addf %313, %314 : vector<3x16xf32>
    %cst_207 = arith.constant dense<0.000000e+00> : vector<3xf32>
    %316 = vector.multi_reduction <add>, %315, %cst_207 [1] : vector<3x16xf32> to vector<3xf32>
    %317 = vector.shape_cast %316 : vector<3xf32> to vector<3x1xf32>
    %cst_208 = arith.constant 1.600000e+01 : f32
    %318 = vector.broadcast %cst_208 : f32 to vector<3x1xf32>
    %319 = arith.divf %317, %318 : vector<3x1xf32>
    %320 = vector.broadcast %319 : vector<3x1xf32> to vector<3x16xf32>
    %321 = arith.subf %315, %320 : vector<3x16xf32>
    %322 = arith.mulf %321, %321 : vector<3x16xf32>
    %cst_209 = arith.constant dense<0.000000e+00> : vector<3xf32>
    %323 = vector.multi_reduction <add>, %322, %cst_209 [1] : vector<3x16xf32> to vector<3xf32>
    %324 = vector.shape_cast %323 : vector<3xf32> to vector<3x1xf32>
    %cst_210 = arith.constant 1.600000e+01 : f32
    %325 = vector.broadcast %cst_210 : f32 to vector<3x1xf32>
    %326 = arith.divf %324, %325 : vector<3x1xf32>
    %327 = vector.broadcast %319 : vector<3x1xf32> to vector<3x16xf32>
    %328 = arith.subf %315, %327 : vector<3x16xf32>
    %cst_211 = arith.constant 9.99999974E-6 : f32
    %329 = vector.broadcast %cst_211 : f32 to vector<3x1xf32>
    %330 = arith.addf %326, %329 : vector<3x1xf32>
    %331 = math.rsqrt %330 : vector<3x1xf32>
    %332 = vector.broadcast %331 : vector<3x1xf32> to vector<3x16xf32>
    %333 = arith.mulf %328, %332 : vector<3x16xf32>
    %334 = vector.broadcast %265 : vector<1x16xf32> to vector<3x16xf32>
    %335 = arith.mulf %333, %334 : vector<3x16xf32>
    %336 = vector.broadcast %266 : vector<1x16xf32> to vector<3x16xf32>
    %337 = arith.addf %335, %336 : vector<3x16xf32>
    %338 = arith.addf %315, %337 : vector<3x16xf32>
    %339 = arith.mulf %338, %271 : vector<3x16xf32>
    %cst_212 = arith.constant dense<0.000000e+00> : vector<3xf32>
    %340 = vector.multi_reduction <add>, %339, %cst_212 [1] : vector<3x16xf32> to vector<3xf32>
    %341 = vector.shape_cast %340 : vector<3xf32> to vector<3x1xf32>
    %342 = arith.addf %341, %272 : vector<3x1xf32>
    %343 = vector.shape_cast %342 : vector<3x1xf32> to vector<3x1xf32>
    %344 = vector.broadcast %343 : vector<3x1xf32> to vector<3x128xf32>
    %c0_213 = arith.constant 0 : index
    %c0_214 = arith.constant 0 : index
    %c0_215 = arith.constant 0 : index
    %345 = vector.load %arg22[%c0_213, %c0_214, %c0_215] : memref<2x3x128xf32, #tpu.memory_space<vmem>>, vector<1x3x128xf32>
    %346 = vector.shape_cast %345 : vector<1x3x128xf32> to vector<3x128xf32>
    %347 = vector.shape_cast %344 : vector<3x128xf32> to vector<1x3x128xf32>
    tpu.vector_store %arg22[%c0_213, %c0_214, %c0_215], %347 {strides = array<i32>} : memref<2x3x128xf32, #tpu.memory_space<vmem>>, vector<1x3x128xf32>,
    %c16_216 = arith.constant 16 : index
    %c0_217 = arith.constant 0 : index
    %348 = vector.load %arg23[%c16_216, %c0_217] : memref<32x16xf32, #tpu.memory_space<vmem>>, vector<16x16xf32>
    %cst_218 = arith.constant dense<0.000000e+00> : vector<16xf32>
    %349 = vector.multi_reduction <add>, %348, %cst_218 [1] : vector<16x16xf32> to vector<16xf32>
    %350 = vector.shape_cast %349 : vector<16xf32> to vector<16x1xf32>
    %cst_219 = arith.constant 1.600000e+01 : f32
    %351 = vector.broadcast %cst_219 : f32 to vector<16x1xf32>
    %352 = arith.divf %350, %351 : vector<16x1xf32>
    %353 = vector.broadcast %352 : vector<16x1xf32> to vector<16x16xf32>
    %354 = arith.subf %348, %353 : vector<16x16xf32>
    %355 = arith.mulf %354, %354 : vector<16x16xf32>
    %cst_220 = arith.constant dense<0.000000e+00> : vector<16xf32>
    %356 = vector.multi_reduction <add>, %355, %cst_220 [1] : vector<16x16xf32> to vector<16xf32>
    %357 = vector.shape_cast %356 : vector<16xf32> to vector<16x1xf32>
    %cst_221 = arith.constant 1.600000e+01 : f32
    %358 = vector.broadcast %cst_221 : f32 to vector<16x1xf32>
    %359 = arith.divf %357, %358 : vector<16x1xf32>
    %360 = vector.broadcast %352 : vector<16x1xf32> to vector<16x16xf32>
    %361 = arith.subf %348, %360 : vector<16x16xf32>
    %cst_222 = arith.constant 9.99999974E-6 : f32
    %362 = vector.broadcast %cst_222 : f32 to vector<16x1xf32>
    %363 = arith.addf %359, %362 : vector<16x1xf32>
    %364 = math.rsqrt %363 : vector<16x1xf32>
    %365 = vector.broadcast %364 : vector<16x1xf32> to vector<16x16xf32>
    %366 = arith.mulf %361, %365 : vector<16x16xf32>
    %367 = vector.broadcast %263 : vector<1x16xf32> to vector<16x16xf32>
    %368 = arith.mulf %366, %367 : vector<16x16xf32>
    %369 = vector.broadcast %264 : vector<1x16xf32> to vector<16x16xf32>
    %370 = arith.addf %368, %369 : vector<16x16xf32>
    %cst_223 = arith.constant dense<0.000000e+00> : vector<16x32xf32>
    %371 = tpu.matmul %370, %268, %cst_223 {dimension_numbers = #tpu.dot_dimension_numbers<[1], [0], [0], [1], [0, 0, 1, 1], [], []>} : vector<16x16xf32>, vector<16x32xf32>, vector<16x32xf32> -> vector<16x32xf32>
    %372 = vector.extract_strided_slice %371 {offsets = [0, 0], sizes = [16, 16], strides = [1, 1]} : vector<16x32xf32> to vector<16x16xf32>
    %373 = vector.extract_strided_slice %371 {offsets = [0, 16], sizes = [16, 16], strides = [1, 1]} : vector<16x32xf32> to vector<16x16xf32>
    %cst_224 = arith.constant dense<0.000000e+00> : vector<3x16xf32>
    %374 = tpu.matmul %267, %372, %cst_224 {dimension_numbers = #tpu.dot_dimension_numbers<[1], [1], [0], [0], [0, 0, 1, 0], [], []>} : vector<3x16xf32>, vector<16x16xf32>, vector<3x16xf32> -> vector<3x16xf32>
    %cst_225 = arith.constant 2.500000e-01 : f32
    %375 = vector.broadcast %cst_225 : f32 to vector<3x16xf32>
    %376 = arith.mulf %374, %375 : vector<3x16xf32>
    %cst_226 = arith.constant dense<0xFF800000> : vector<3xf32>
    %377 = vector.multi_reduction <maximumf>, %376, %cst_226 [1] : vector<3x16xf32> to vector<3xf32>
    %378 = vector.shape_cast %377 : vector<3xf32> to vector<3x1xf32>
    %379 = vector.broadcast %378 : vector<3x1xf32> to vector<3x16xf32>
    %380 = arith.subf %376, %379 : vector<3x16xf32>
    %381 = math.exp %380 : vector<3x16xf32>
    %cst_227 = arith.constant dense<0.000000e+00> : vector<3xf32>
    %382 = vector.multi_reduction <add>, %381, %cst_227 [1] : vector<3x16xf32> to vector<3xf32>
    %383 = vector.shape_cast %382 : vector<3xf32> to vector<3x1xf32>
    %384 = tpu.reciprocal %383 : vector<3x1xf32> -> vector<3x1xf32>
    %385 = vector.broadcast %384 : vector<3x1xf32> to vector<3x16xf32>
    %386 = arith.mulf %381, %385 : vector<3x16xf32>
    %cst_228 = arith.constant dense<0.000000e+00> : vector<3x16xf32>
    %387 = tpu.matmul %386, %373, %cst_228 {dimension_numbers = #tpu.dot_dimension_numbers<[1], [0], [0], [1], [0, 0, 1, 1], [], []>} : vector<3x16xf32>, vector<16x16xf32>, vector<3x16xf32> -> vector<3x16xf32>
    %cst_229 = arith.constant dense<0.000000e+00> : vector<3x16xf32>
    %388 = tpu.matmul %387, %269, %cst_229 {dimension_numbers = #tpu.dot_dimension_numbers<[1], [0], [0], [1], [0, 0, 1, 1], [], []>} : vector<3x16xf32>, vector<16x16xf32>, vector<3x16xf32> -> vector<3x16xf32>
    %389 = vector.broadcast %270 : vector<1x16xf32> to vector<3x16xf32>
    %390 = arith.addf %388, %389 : vector<3x16xf32>
    %cst_230 = arith.constant dense<0.000000e+00> : vector<3xf32>
    %391 = vector.multi_reduction <add>, %390, %cst_230 [1] : vector<3x16xf32> to vector<3xf32>
    %392 = vector.shape_cast %391 : vector<3xf32> to vector<3x1xf32>
    %cst_231 = arith.constant 1.600000e+01 : f32
    %393 = vector.broadcast %cst_231 : f32 to vector<3x1xf32>
    %394 = arith.divf %392, %393 : vector<3x1xf32>
    %395 = vector.broadcast %394 : vector<3x1xf32> to vector<3x16xf32>
    %396 = arith.subf %390, %395 : vector<3x16xf32>
    %397 = arith.mulf %396, %396 : vector<3x16xf32>
    %cst_232 = arith.constant dense<0.000000e+00> : vector<3xf32>
    %398 = vector.multi_reduction <add>, %397, %cst_232 [1] : vector<3x16xf32> to vector<3xf32>
    %399 = vector.shape_cast %398 : vector<3xf32> to vector<3x1xf32>
    %cst_233 = arith.constant 1.600000e+01 : f32
    %400 = vector.broadcast %cst_233 : f32 to vector<3x1xf32>
    %401 = arith.divf %399, %400 : vector<3x1xf32>
    %402 = vector.broadcast %394 : vector<3x1xf32> to vector<3x16xf32>
    %403 = arith.subf %390, %402 : vector<3x16xf32>
    %cst_234 = arith.constant 9.99999974E-6 : f32
    %404 = vector.broadcast %cst_234 : f32 to vector<3x1xf32>
    %405 = arith.addf %401, %404 : vector<3x1xf32>
    %406 = math.rsqrt %405 : vector<3x1xf32>
    %407 = vector.broadcast %406 : vector<3x1xf32> to vector<3x16xf32>
    %408 = arith.mulf %403, %407 : vector<3x16xf32>
    %409 = vector.broadcast %265 : vector<1x16xf32> to vector<3x16xf32>
    %410 = arith.mulf %408, %409 : vector<3x16xf32>
    %411 = vector.broadcast %266 : vector<1x16xf32> to vector<3x16xf32>
    %412 = arith.addf %410, %411 : vector<3x16xf32>
    %413 = arith.addf %390, %412 : vector<3x16xf32>
    %414 = arith.mulf %413, %271 : vector<3x16xf32>
    %cst_235 = arith.constant dense<0.000000e+00> : vector<3xf32>
    %415 = vector.multi_reduction <add>, %414, %cst_235 [1] : vector<3x16xf32> to vector<3xf32>
    %416 = vector.shape_cast %415 : vector<3xf32> to vector<3x1xf32>
    %417 = arith.addf %416, %272 : vector<3x1xf32>
    %418 = vector.shape_cast %417 : vector<3x1xf32> to vector<3x1xf32>
    %419 = vector.broadcast %418 : vector<3x1xf32> to vector<3x128xf32>
    %c1_236 = arith.constant 1 : index
    %c0_237 = arith.constant 0 : index
    %c0_238 = arith.constant 0 : index
    %420 = vector.load %arg22[%c1_236, %c0_237, %c0_238] : memref<2x3x128xf32, #tpu.memory_space<vmem>>, vector<1x3x128xf32>
    %421 = vector.shape_cast %420 : vector<1x3x128xf32> to vector<3x128xf32>
    %422 = vector.shape_cast %419 : vector<3x128xf32> to vector<1x3x128xf32>
    tpu.vector_store %arg22[%c1_236, %c0_237, %c0_238], %422 {strides = array<i32>} : memref<2x3x128xf32, #tpu.memory_space<vmem>>, vector<1x3x128xf32>,
    return
  }
}

</mosaic_0001>

<bundles_post_ra>
// kernel: tile.28
= control target key start
LH: loop header
LB: loop body
LE: loop exit
PB: predicated region body
PF: predicated region fallthrough
CT: control target
= control target key end

     0   :  { %s22_s0 = inlined_call_operand.vmem [shape: f32[8], index: 0, kind: input, shape index: {}]   ;;  %s23_s1 = inlined_call_operand.vmem [shape: f32[8,8], index: 1, kind: output, shape index: {}]  }
   0x1   :  { %v4_v0 = vld [vmem:[%s22_s0] ss:$0 sm:$0xff] }
   0x2   :  { %5 = vst [vmem:[%s23_s1] sm:$0xff] %v4_v0 }

// kernel: tile.29
= control target key start
LH: loop header
LB: loop body
LE: loop exit
PB: predicated region body
PF: predicated region fallthrough
CT: control target
= control target key end

     0   :  { %s67_s10 = smov 56   ;;  %s68_s11 = smov 40   ;;  %vm3_vm0 = vcmask 64512   ;;  %vm9_vm1 = vcmask 523712   ;;  %vm15_vm2 = vcmask 458112   ;;  %vm21_vm3 = vcmask 392512   ;;  %s111_s0 = inlined_call_operand.vmem [shape: f32[8,8], index: 0, kind: input, shape index: {}]   ;;  %s112_s1 = inlined_call_operand.vmem [shape: f32[1,64], index: 1, kind: output, shape index: {}]  }
   0x1   :  { %v53_v0 = vld [vmem:[%s111_s0 + $0x7] sm:$0x1]   ;;  %v55_v1 = vld [vmem:[%s111_s0 + $0x5] sm:$0x1]   ;;  %v57_v2 = vld [vmem:[%s111_s0 + $0x3] sm:$0x1]  }
   0x2   :  { %7 = vrot.lane.b32.xlu0 %v53_v0, %s67_s10  ;;  %19 = vrot.lane.b32.xlu1 %v55_v1, %s68_s11  ;;  %s69_s14 = smov 24   ;;  %v54_v3 = vld [vmem:[%s111_s0 + $0x6] sm:$0x1]   ;;  %v56_v4 = vld [vmem:[%s111_s0 + $0x4] sm:$0x1]   ;;  %s70_s21 = smov 48  }
   0x3   :  { %31 = vrot.lane.b32.xlu2 %v57_v2, %s69_s14  ;;  %v58_v5 = vld [vmem:[%s111_s0 + $0x2] sm:$0x1]   ;;  %s71_s22 = smov 32   ;;  %s72_s23 = smov 16   ;;  %v59_v6 = vld [vmem:[%s111_s0 + $0x1] sm:$0x1]  }
   0x4   :  { %s73_s26 = smov 8   ;;  %v2_v7 = vld [vmem:[%s111_s0] sm:$0x1]   ;;  %vm27_vm4 = vcmask 326912   ;;  %vm33_vm5 = vcmask 261312   ;;  %vm39_vm6 = vcmask 195712  }
   0x5   :  { %4 = vst.msk [vmem:[#allocation0] sm:$0x1] %vm3_vm0, %v2_v7   ;;  %vm45_vm7 = vcmask 130112  }
   0xa   :  { %13 = vrot.lane.b32.xlu0 %v54_v3, %s70_s21  ;;  %25 = vrot.lane.b32.xlu1 %v56_v4, %s71_s22 }
   0xb   :  { %37 = vrot.lane.b32.xlu2 %v58_v5, %s72_s23 }
  0x12   :  { %43 = vrot.lane.b32.xlu0 %v59_v6, %s73_s26 }
  0x5d   :  { %v32_v8 = vpop.permute.xlu2 %31  }
  0x65   :  { %v38_v9 = vpop.permute.xlu2 %37  }
  0x74   :  { %v8_v10 = vpop.permute.xlu0 %7   ;;  %v20_v11 = vpop.permute.xlu1 %19  }
  0x75   :  { %10 = vst.msk [vmem:[#allocation0] sm:$0x1] %vm9_vm1, %v8_v10  }
  0x7c   :  { %v14_v12 = vpop.permute.xlu0 %13   ;;  %v26_v13 = vpop.permute.xlu1 %25  }
  0x7d   :  { %16 = vst.msk [vmem:[#allocation0] sm:$0x1] %vm15_vm2, %v14_v12  }
  0x7e   :  { %22 = vst.msk [vmem:[#allocation0] sm:$0x1] %vm21_vm3, %v20_v11  }
  0x7f   :  { %28 = vst.msk [vmem:[#allocation0] sm:$0x1] %vm27_vm4, %v26_v13  }
  0x80   :  { %34 = vst.msk [vmem:[#allocation0] sm:$0x1] %vm33_vm5, %v32_v8  }
  0x81   :  { %40 = vst.msk [vmem:[#allocation0] sm:$0x1] %vm39_vm6, %v38_v9  }
  0x84   :  { %v44_v14 = vpop.permute.xlu0 %43  }
  0x85   :  { %46 = vst.msk [vmem:[#allocation0] sm:$0x1] %vm45_vm7, %v44_v14  }
  0x8c   :  { %v49_v15 = vld [vmem:[#allocation0] sm:$0x1] }
  0x8d   :  { %52 = vst [vmem:[%s112_s1] sm:$0x1] %v49_v15 }

// kernel: tile.39
= control target key start
LH: loop header
LB: loop body
LE: loop exit
PB: predicated region body
PF: predicated region fallthrough
CT: control target
= control target key end

     0   :  { %s37_s8 = smov 16   ;;  %s38_s9 = smov 32   ;;  %vm7_vm0 = vcmask 130048   ;;  %vm13_vm1 = vcmask 523648   ;;  %vm19_vm2 = vcmask 392448   ;;  %vm25_vm3 = vcmask 261248   ;;  %s55_s0 = inlined_call_operand.vmem [shape: f32[4,16], index: 0, kind: input, shape index: {}]   ;;  %s56_s1 = inlined_call_operand.vmem [shape: f32[1,64], index: 1, kind: output, shape index: {}]  }
   0x1   :  { %v4_v0 = vld [vmem:[%s55_s0] sm:$0xf]  ;;  %s36_s0 = smov 48  }
   0x2   :  { %5 = vst [vmem:[#allocation1] sm:$0xf] %v4_v0 }
   0x9   :  { %v10_v1 = vld [vmem:[#allocation1 + $0x3] sm:$0x1]   ;;  %v22_v2 = vld [vmem:[#allocation1 + $0x1] sm:$0x1]   ;;  %v16_v3 = vld [vmem:[#allocation1 + $0x2] sm:$0x1]  }
   0xa   :  { %11 = vrot.lane.b32.xlu0 %v10_v1, %s36_s0  ;;  %23 = vrot.lane.b32.xlu1 %v22_v2, %s37_s8  ;;  %v6_v4 = vld [vmem:[#allocation1] sm:$0x1]  }
   0xb   :  { %8 = vst.msk [vmem:[#allocation0] sm:$0x1] %vm7_vm0, %v6_v4  }
  0x12   :  { %17 = vrot.lane.b32.xlu0 %v16_v3, %s38_s9 }
  0x7c   :  { %v12_v5 = vpop.permute.xlu0 %11   ;;  %v24_v6 = vpop.permute.xlu1 %23  }
  0x7d   :  { %14 = vst.msk [vmem:[#allocation0] sm:$0x1] %vm13_vm1, %v12_v5  }
  0x84   :  { %v18_v7 = vpop.permute.xlu0 %17  }
  0x85   :  { %20 = vst.msk [vmem:[#allocation0] sm:$0x1] %vm19_vm2, %v18_v7  }
  0x86   :  { %26 = vst.msk [vmem:[#allocation0] sm:$0x1] %vm25_vm3, %v24_v6  }
  0x8d   :  { %v29_v8 = vld [vmem:[#allocation0] sm:$0x1] }
  0x8e   :  { %32 = vst [vmem:[%s56_s1] sm:$0x1] %v29_v8 }

// kernel: tile.38
= control target key start
LH: loop header
LB: loop body
LE: loop exit
PB: predicated region body
PF: predicated region fallthrough
CT: control target
= control target key end

     0   :  { %s22_s0 = inlined_call_operand.vmem [shape: f32[16], index: 0, kind: input, shape index: {}]   ;;  %s23_s1 = inlined_call_operand.vmem [shape: f32[4,16], index: 1, kind: output, shape index: {}]  }
   0x1   :  { %v4_v0 = vld [vmem:[%s22_s0] ss:$0 sm:$0xff] }
   0x2   :  { %5 = vst [vmem:[%s23_s1] sm:$0xf] %v4_v0 }

// kernel: global_pred_forward.1
= control target key start
LH: loop header
LB: loop body
LE: loop exit
PB: predicated region body
PF: predicated region fallthrough
CT: control target
= control target key end

     0   :  { %vm159_vm0 = vcmask 130048   ;;  %vm361_vm6 = vcmask 64512   ;;  %vm408_vm7 = vcmask 523264   ;;  %vm518_vm8 = vcmask 1043456   ;;  %s2702_s0 = inlined_call_operand.vmem [shape: f32[2,4,16,16], index: 0, kind: input, shape index: {}]   ;;  %s2703_s2 = inlined_call_operand.vmem [shape: f32[3,16,64], index: 2, kind: input, shape index: {}]   ;;  %s2704_s1 = inlined_call_operand.vmem [shape: f32[3,8,16], index: 1, kind: input, shape index: {}]   ;;  %s2705_s3 = inlined_call_operand.vmem [shape: f32[1,64], index: 3, kind: input, shape index: {}]   ;;  %s2706_s4 = inlined_call_operand.vmem [shape: f32[1,64], index: 4, kind: input, shape index: {}]   ;;  %s2707_s6 = inlined_call_operand.vmem [shape: f32[3,64,64], index: 6, kind: input, shape index: {}]   ;;  %s2708_s5 = inlined_call_operand.vmem [shape: f32[3,4,8], index: 5, kind: input, shape index: {}]   ;;  %s2709_s7 = inlined_call_operand.vmem [shape: f32[1,64], index: 7, kind: input, shape index: {}]   ;;  %s2710_s8 = inlined_call_operand.vmem [shape: f32[1,64], index: 8, kind: input, shape index: {}]   ;;  %s2711_s11 = inlined_call_operand.vmem [shape: f32[1,64], index: 11, kind: input, shape index: {}]   ;;  %s2712_s10 = inlined_call_operand.vmem [shape: f32[3,64,64], index: 10, kind: input, shape index: {}]   ;;  %s2713_s9 = inlined_call_operand.vmem [shape: f32[3,4,4], index: 9, kind: input, shape index: {}]   ;;  %s2714_s12 = inlined_call_operand.vmem [shape: f32[1,16], index: 12, kind: input, shape index: {}]   ;;  %s2715_s13 = inlined_call_operand.vmem [shape: f32[1,16], index: 13, kind: input, shape index: {}]   ;;  %s2716_s15 = inlined_call_operand.vmem [shape: f32[16,32], index: 15, kind: input, shape index: {}]   ;;  %s2717_s14 = inlined_call_operand.vmem [shape: f32[3,16], index: 14, kind: input, shape index: {}]   ;;  %s2718_s16 = inlined_call_operand.vmem [shape: f32[16,16], index: 16, kind: input, shape index: {}]   ;;  %s2719_s17 = inlined_call_operand.vmem [shape: f32[1,16], index: 17, kind: input, shape index: {}]   ;;  %s2720_s18 = inlined_call_operand.vmem [shape: f32[1,16], index: 18, kind: input, shape index: {}]   ;;  %s2721_s19 = inlined_call_operand.vmem [shape: f32[1,16], index: 19, kind: input, shape index: {}]   ;;  %s2722_s20 = inlined_call_operand.vmem [shape: f32[3,16], index: 20, kind: input, shape index: {}]   ;;  %s2723_s21 = inlined_call_operand.vmem [shape: f32[3,1], index: 21, kind: input, shape index: {}]   ;;  %s2724_s22 = inlined_call_operand.vmem [shape: f32[2,3,128], index: 22, kind: output, shape index: {}]  }
   0x1   :  { %2739 = sst [smem:[#allocation11_spill]] %s2702_s0  ;;  %vm514_vm9 = vcmask 31744   ;;  %vm659_vm10 = vcmask 122880   ;;  %vm674_vm11 = vcmask 123905   ;;  %vm679_vm12 = vcmask 124930  }
   0x2   :  { %2740 = sst [smem:[#allocation12_spill]] %s2703_s2  ;;  %vm684_vm13 = vcmask 125955  }
   0x3   :  { %2741 = sst [smem:[#allocation13_spill]] %s2704_s1 }
   0x4   :  { %2742 = sst [smem:[#allocation14_spill]] %s2705_s3 }
   0x5   :  { %2743 = sst [smem:[#allocation15_spill]] %s2706_s4 }
   0x6   :  { %2744 = sst [smem:[#allocation16_spill]] %s2707_s6 }
   0x7   :  { %2745 = sst [smem:[#allocation17_spill]] %s2708_s5 }
   0x8   :  { %s2746_s29 = sld [smem:[#allocation11_spill]] }
   0x9   :  { %s2747_s0 = sld [smem:[#allocation12_spill]] }
   0xa   :  { %s2748_s5 = sld [smem:[#allocation13_spill]] }
   0xb   :  { %s2749_s26 = sld [smem:[#allocation14_spill]] }
   0xc   :  { %s2750_s27 = sld [smem:[#allocation15_spill]] }
   0xd   :  { %s2751_s30 = sld [smem:[#allocation16_spill]] }
   0xe   :  { %v152_v0 = vld [vmem:[%s2746_s29 + $0x8] sm:$0xff]  ;;  %v154_v1 = vld [vmem:[%s2746_s29 + $0x18] sm:$0xff]  ;;  %v151_v7 = vld [vmem:[%s2746_s29] sm:$0xff]  ;;  %s2752_s2 = sld [smem:[#allocation17_spill]] }
   0xf   :  { %v156_v2 = vld [vmem:[%s2746_s29 + $0x28] sm:$0xff]  ;;  %v158_v3 = vld [vmem:[%s2746_s29 + $0x38] sm:$0xff]  ;;  %v167_v4 = vsel %vm159_vm0, %v152_v0, -inf  ;;  %v168_v5 = vsel %vm159_vm0, %v154_v1, -inf  ;;  %v153_v8 = vld [vmem:[%s2746_s29 + $0x10] sm:$0xff]  ;;  %v160_v13 = vsel %vm159_vm0, %v151_v7, -inf }
  0x10   :  { %v169_v6 = vsel %vm159_vm0, %v156_v2, -inf  ;;  %v171_v10 = vsel %vm159_vm0, %v158_v3, -inf  ;;  %v155_v11 = vld [vmem:[%s2746_s29 + $0x20] sm:$0xff]  ;;  %v157_v12 = vld [vmem:[%s2746_s29 + $0x30] sm:$0xff]  ;;  %v161_v14 = vsel %vm159_vm0, %v153_v8, -inf  ;;  %v1977_v18 = vld [vmem:[%s2747_s0 + $0x18] sm:$0xff] }
  0x11   :  { %v170_v9 = vmax.f32 %v167_v4, %v169_v6  ;;  %v172_v15 = vmax.f32 %v168_v5, %v171_v10  ;;  %v162_v16 = vsel %vm159_vm0, %v155_v11, -inf  ;;  %v164_v17 = vsel %vm159_vm0, %v157_v12, -inf  ;;  %237 = vmatpush.msra.mxu2 %v1977_v18  ;;  %v1983_v21 = vld [vmem:[%s2747_s0 + $0x8] sm:$0xff]  ;;  %v1989_v24 = vld [vmem:[%s2748_s5] sm:$0xff]  ;;  %v2003_v26 = vld [vmem:[%s2748_s5 + $0x10] sm:$0xff] }
  0x12   :  { %v163_v19 = vmax.f32 %v160_v13, %v162_v16  ;;  %v165_v20 = vmax.f32 %v161_v14, %v164_v17  ;;  %260 = vmatpush.msra.mxu3 %v1983_v21  ;;  %v1994_v25 = vld [vmem:[%s2748_s5 + $0x8] sm:$0xff]  ;;  %v2010_v27 = vld [vmem:[%s2747_s0 + $0x10] sm:$0xff]  ;;  %v2015_v28 = vld [vmem:[%s2747_s0] sm:$0xff] }
  0x13   :  { %v173_v22 = vmax.f32 %v170_v9, %v172_v15  ;;  %238 = vmatpush.msra.mxu2 %v2010_v27  ;;  %v2022_v29 = vld [vmem:[%s2747_s0 + $0x28] sm:$0xff]  ;;  %v2028_v30 = vld [vmem:[%s2747_s0 + $0x20] sm:$0xff]  ;;  %v2055_v62 = vld [vmem:[%s2751_s30 + $0x78] sm:$0xff] }
  0x14   :  { %v166_v23 = vmax.f32 %v163_v19, %v165_v20  ;;  %261 = vmatpush.msra.mxu3 %v2015_v28  ;;  %v2037_v37 = vld [vmem:[%s2749_s26] ss:$0 sm:$0xff]  ;;  %v2060_v63 = vld [vmem:[%s2751_s30 + $0x38] sm:$0xff]  ;;  %v2065_v0 = vld [vmem:[%s2751_s30 + $0x70] sm:$0xff] }
  0x15   :  { %191 = vmatpush.msra.mxu0 %v173_v22  ;;  %214 = vmatpush.msra.mxu1 %v173_v22  ;;  %v2042_v40 = vld [vmem:[%s2750_s27] ss:$0 sm:$0xff]  ;;  %v2072_v2 = vld [vmem:[%s2751_s30 + $0x30] sm:$0xff]  ;;  %v2077_v4 = vld [vmem:[%s2751_s30 + $0x68] sm:$0xff] }
  0x16   :  { %v2082_v5 = vld [vmem:[%s2751_s30 + $0x28] sm:$0xff]  ;;  %v2089_v7 = vld [vmem:[%s2751_s30 + $0x60] sm:$0xff]  ;;  %v2101_v10 = vld [vmem:[%s2751_s30 + $0x58] sm:$0xff] }
  0x17   :  { %192 = vmatpush.msra.mxu0 %v166_v23  ;;  %215 = vmatpush.msra.mxu1 %v166_v23  ;;  %v2094_v8 = vld [vmem:[%s2751_s30 + $0x20] sm:$0xff]  ;;  %v2106_v11 = vld [vmem:[%s2751_s30 + $0x18] sm:$0xff]  ;;  %v2113_v13 = vld [vmem:[%s2751_s30 + $0x50] sm:$0xff] }
  0x18   :  { %1698 = vmatmul.msk.f32.vlgmr.msra.gmra.mxu0 %vm159_vm0, %v1989_v24  ;;  %1699 = vmatmul.msk.f32.vlgmr.msra.gmra.mxu1 %vm159_vm0, %v1994_v25  ;;  %v2118_v14 = vld [vmem:[%s2751_s30 + $0x10] sm:$0xff]  ;;  %v2125_v16 = vld [vmem:[%s2751_s30 + $0x48] sm:$0xff] }
  0x19   :  { %283 = vmatpush.msrb.mxu0 %v173_v22  ;;  %306 = vmatpush.msrb.mxu1 %v2022_v29  ;;  %v2130_v17 = vld [vmem:[%s2751_s30 + $0x8] sm:$0xff] }
  0x1b   :  { %284 = vmatpush.msrb.mxu0 %v166_v23  ;;  %307 = vmatpush.msrb.mxu1 %v2028_v30 }
  0x1d   :  { %420 = vmatpush.msra.mxu0 %v2055_v62  ;;  %443 = vmatpush.msra.mxu1 %v2060_v63 }
  0x1f   :  { %421 = vmatpush.msra.mxu0 %v2065_v0  ;;  %444 = vmatpush.msra.mxu1 %v2072_v2 }
  0x20   :  { %1702 = vmatmul.msk.f32.vlgmr.msrb.gmra.mxu0 %vm159_vm0, %v2003_v26 }
  0x21   :  { %422 = vmatpush.msra.mxu0 %v2077_v4  ;;  %445 = vmatpush.msra.mxu1 %v2082_v5 }
  0x23   :  { %423 = vmatpush.msra.mxu0 %v2089_v7  ;;  %446 = vmatpush.msra.mxu1 %v2094_v8 }
  0x25   :  { %424 = vmatpush.msra.mxu0 %v2101_v10  ;;  %447 = vmatpush.msra.mxu1 %v2106_v11 }
  0x27   :  { %425 = vmatpush.msra.mxu0 %v2113_v13  ;;  %448 = vmatpush.msra.mxu1 %v2118_v14 }
  0x29   :  { %426 = vmatpush.msra.mxu0 %v2125_v16  ;;  %449 = vmatpush.msra.mxu1 %v2130_v17 }
  0x95   :  { %v194_v31 = vpop.f32.mrf.mxu0  ;;  %v217_v32 = vpop.f32.mrf.mxu1 }
  0x96   :  { %1700 = vmatmul.msk.f32.vlgmr.msra.gmra.mxu2 %vm159_vm0, %v217_v32  ;;  %1701 = vmatmul.msk.f32.vlgmr.msra.gmra.mxu3 %vm159_vm0, %v194_v31  ;;  %v2730_v31 = vmov -1.0  }
  0x9d   :  { %v286_v33 = vpop.f32.mrf.mxu0 }
  0x9e   :  { %1703 = vmatmul.msk.f32.vlgmr.msrb.gmra.mxu1 %vm159_vm0, %v286_v33 }
 0x119   :  { %v240_v34 = vpop.f32.mrf.mxu2  ;;  %v263_v35 = vpop.f32.mrf.mxu3 }
 0x11a   :  { %v264_v36 = vadd.f32 %v263_v35, %v240_v34 }
 0x11b   :  { %v309_v38 = vpop.f32.mrf.mxu1 }
 0x11c   :  { %v312_v39 = vadd.f32 %v309_v38, %v264_v36  ;;  %v2142_v38 = vld [vmem:[%s2752_s2] sm:$0xf] }
 0x11e   :  { %v316_v41 = vmul.f32 %v2037_v37, %v312_v39  ;;  %v2147_v39 = vld [vmem:[%s2752_s2 + $0x4] sm:$0xf] }
 0x120   :  { %v2046_v42 = vadd.f32 %v2042_v40, %v316_v41  ;;  %v2152_v41 = vld [vmem:[%s2751_s30 + $0xb8] sm:$0xff] }
 0x122   :  { %v2049_v43 = vmul.f32 0.70710677, %v2046_v42  ;;  %v321_v34 = vmul.f32 0.5, %v2046_v42  ;;  %v2161_v42 = vld [vmem:[%s2751_s30 + $0xb0] sm:$0xff] }
 0x124   :  { %v325_v44 = vand.u32 2147483647, %v2049_v43  ;;  %vm323_vm5 = vcmp.ge.f32.partialorder %v2049_v43, 0.0  ;;  %v2167_v43 = vld [vmem:[%s2751_s30 + $0xa8] sm:$0xff] }
 0x125   :  { %v324_v32 = vsel %vm323_vm5, 1.0, %v2730_v31 }
 0x126   :  { %v326_v45 = vmul.f32 0.3275911, %v325_v44  ;;  %v352_v56 = vsub.f32 0.0, %v325_v44 }
 0x128   :  { %v327_v46 = vadd.f32 1.0, %v326_v45  ;;  %v353_v60 = vmul.f32 %v352_v56, %v325_v44  ;;  %v2173_v44 = vld [vmem:[%s2752_s2 + $0x8] sm:$0xf]  ;;  %v2181_v45 = vld [vmem:[%s2751_s30 + $0x40] sm:$0xff]  ;;  %v2231_v56 = vld [vmem:[%s2712_s10 + $0x70] sm:$0xff] }
 0x129   :  { %427 = vmatpush.msra.mxu0 %v2181_v45 }
 0x12a   :  { %1791 = vrcp.f32 %v327_v46  ;;  %v339_v50 = vand.u32 2147483648, %v327_v46  ;;  %v337_v52 = vand.u32 2147483647, %v327_v46  ;;  %vm333_vm2 = vweird.f32 %v327_v46 }
 0x12b   :  { %v354_v3 = vmul.f32 1.442695, %v353_v60  ;;  %v2255_v60 = vld [vmem:[%s2712_s10 + $0x50] sm:$0xff] }
 0x12c   :  { %v340_v54 = vor.u32 1.1754944e-38, %v339_v50  ;;  %vm338_vm4 = vcmp.eq.f32.partialorder %v337_v52, 8.507059e+37  ;;  %v2210_v50 = vld [vmem:[%s2751_s30 + $0x88] sm:$0xff] }
 0x12d   :  { %1793 = vpow2.f32 %v354_v3 }
 0x130   :  { %v1792_v47 = vpop.eup %1791 }
 0x131   :  { %v329_v48 = vmul.f32 %v1792_v47, %v327_v46  ;;  %vm334_vm1 = vweird.f32 %v1792_v47  ;;  %v2186_v46 = vld [vmem:[%s2751_s30] sm:$0xff] }
 0x132   :  { %vm335_vm3 = vmor %vm333_vm2, %vm334_vm1  ;;  %450 = vmatpush.msra.mxu1 %v2186_v46 }
 0x133   :  { %v330_v49 = vsub.f32 1.0, %v329_v48  ;;  %v1794_v20 = vpop.eup %1793  ;;  %v2198_v48 = vld [vmem:[%s2751_s30 + $0x98] sm:$0xff] }
 0x135   :  { %v331_v51 = vmul.f32 %v1792_v47, %v330_v49  ;;  %v2204_v49 = vld [vmem:[%s2751_s30 + $0x90] sm:$0xff] }
 0x137   :  { %v332_v53 = vadd.f32 %v1792_v47, %v331_v51  ;;  %v2217_v51 = vld [vmem:[%s2751_s30 + $0x80] sm:$0xff] }
 0x139   :  { %v336_v55 = vsel %vm335_vm3, %v1792_v47, %v332_v53  ;;  %v2191_v47 = vld [vmem:[%s2751_s30 + $0xa0] sm:$0xff] }
 0x13a   :  { %v341_v57 = vsel %vm338_vm4, %v340_v54, %v336_v55  ;;  %v2226_v55 = vld [vmem:[%s2712_s10 + $0x78] sm:$0xff] }
 0x13b   :  { %v343_v58 = vmul.f32 1.0614054, %v341_v57  ;;  %576 = vmatpush.msrb.mxu1 %v2226_v55 }
 0x13d   :  { %v344_v59 = vadd.f32 -1.4531521, %v343_v58  ;;  %577 = vmatpush.msrb.mxu1 %v2231_v56  ;;  %v2243_v58 = vld [vmem:[%s2712_s10 + $0x60] sm:$0xff] }
 0x13f   :  { %v345_v61 = vmul.f32 %v344_v59, %v341_v57  ;;  %v2249_v59 = vld [vmem:[%s2712_s10 + $0x58] sm:$0xff] }
 0x141   :  { %v346_v1 = vadd.f32 1.4214138, %v345_v61  ;;  %v2261_v61 = vld [vmem:[%s2712_s10 + $0x48] sm:$0xff] }
 0x143   :  { %v347_v6 = vmul.f32 %v346_v1, %v341_v57 }
 0x145   :  { %v348_v9 = vadd.f32 -0.28449672, %v347_v6 }
 0x147   :  { %v349_v12 = vmul.f32 %v348_v9, %v341_v57  ;;  %v2268_v9 = vld [vmem:[%s2709_s7] ss:$0 sm:$0xff] }
 0x149   :  { %v350_v15 = vadd.f32 0.2548296, %v349_v12 }
 0x14b   :  { %v351_v19 = vmul.f32 %v350_v15, %v341_v57  ;;  %v2237_v57 = vld [vmem:[%s2712_s10 + $0x68] sm:$0xff] }
 0x14c   :  { %578 = vmatpush.msrb.mxu1 %v2237_v57 }
 0x14d   :  { %v356_v22 = vmul.f32 %v1794_v20, %v351_v19  ;;  %v2273_v19 = vld [vmem:[%s2710_s8] ss:$0 sm:$0xff]  ;;  %s1822_s8 = smov 80  }
 0x14e   :  { %579 = vmatpush.msrb.mxu1 %v2243_v58 }
 0x14f   :  { %v357_v23 = vsub.f32 1.0, %v356_v22 }
 0x150   :  { %580 = vmatpush.msrb.mxu1 %v2249_v59 }
 0x151   :  { %v358_v33 = vmul.f32 %v357_v23, %v324_v32  ;;  %v2282_v23 = vld [vmem:[%s2713_s9] sm:$0xf]  ;;  %v2287_v32 = vld [vmem:[%s2713_s9 + $0x4] sm:$0xf] }
 0x152   :  { %581 = vmatpush.msrb.mxu1 %v2255_v60  ;;  %2753 = vst [vmem:[#allocation3_spill] sm:$0xff] %v2287_v32 }
 0x153   :  { %v359_v35 = vadd.f32 1.0, %v358_v33  ;;  %v2292_v33 = vld [vmem:[%s2713_s9 + $0x8] sm:$0xf] }
 0x154   :  { %582 = vmatpush.msrb.mxu1 %v2261_v61 }
 0x155   :  { %v360_v36 = vmul.f32 %v359_v35, %v321_v34  ;;  %v2301_v34 = vld [vmem:[%s2712_s10 + $0x38] sm:$0xff] }
 0x156   :  { %2754 = vst [vmem:[#allocation4_spill] sm:$0xff] %v2301_v34  ;;  %v2306_v35 = vld [vmem:[%s2712_s10 + $0xb8] sm:$0xff] }
 0x157   :  { %380 = vmatpush.msrb.mxu2 %v360_v36  ;;  %403 = vmatpush.msrb.mxu3 %v360_v36  ;;  %2755 = vst [vmem:[#allocation5_spill] sm:$0xff] %v2306_v35 }
 0x158   :  { %1704 = vmatmul.msk.f32.vlgmr.msrb.gmra.mxu2 %vm361_vm6, %v2142_v38  ;;  %1705 = vmatmul.msk.f32.vlgmr.msrb.gmra.mxu3 %vm361_vm6, %v2147_v39 }
 0x159   :  { %473 = vmatpush.msra.mxu2 %v360_v36  ;;  %489 = vmatpush.msra.mxu3 %v2152_v41  ;;  %v2319_v36 = vld [vmem:[%s2712_s10 + $0x30] sm:$0xff] }
 0x15a   :  { %2756 = vst [vmem:[#allocation6_spill] sm:$0xff] %v2319_v36 }
 0x15b   :  { %490 = vmatpush.msra.mxu3 %v2161_v42 }
 0x15d   :  { %491 = vmatpush.msra.mxu3 %v2167_v43 }
 0x15f   :  { %492 = vmatpush.msra.mxu3 %v2191_v47 }
 0x160   :  { %1708 = vmatmul.msk.f32.vlgmr.msra.gmra.mxu2 %vm361_vm6, %v2173_v44 }
 0x161   :  { %493 = vmatpush.msra.mxu3 %v2198_v48 }
 0x163   :  { %494 = vmatpush.msra.mxu3 %v2204_v49 }
 0x165   :  { %495 = vmatpush.msra.mxu3 %v2210_v50 }
 0x167   :  { %496 = vmatpush.msra.mxu3 %v2217_v51 }
 0x1db   :  { %v382_v52 = vpop.f32.mrf.mxu2  ;;  %v405_v53 = vpop.f32.mrf.mxu3 }
 0x1dc   :  { %1706 = vmatmul.msk.f32.vlgmr.msra.gmra.mxu0 %vm408_vm7, %v405_v53  ;;  %1707 = vmatmul.msk.f32.vlgmr.msra.gmra.mxu1 %vm408_vm7, %v382_v52  ;;  %v2324_v52 = vld [vmem:[%s2712_s10 + $0xb0] sm:$0xff]  ;;  %v2331_v53 = vld [vmem:[%s2712_s10 + $0x28] sm:$0xff] }
 0x1dd   :  { %2757 = vst [vmem:[#allocation7_spill] sm:$0xff] %v2324_v52 }
 0x1de   :  { %2758 = vst [vmem:[#allocation8_spill] sm:$0xff] %v2331_v53 }
 0x1e3   :  { %v475_v54 = vpop.f32.mrf.mxu2 }
 0x1e4   :  { %1709 = vmatmul.msk.f32.vlgmr.msra.gmra.mxu3 %vm408_vm7, %v475_v54  ;;  %v2336_v54 = vld [vmem:[%s2712_s10 + $0xa8] sm:$0xff] }
 0x1e5   :  { %2759 = vst [vmem:[#allocation9_spill] sm:$0xff] %v2336_v54 }
 0x259   :  { %v429_v1 = vpop.f32.mrf.mxu0  ;;  %v452_v3 = vpop.f32.mrf.mxu1 }
 0x25a   :  { %v453_v6 = vadd.f32 %v452_v3, %v429_v1  ;;  %v2343_v1 = vld [vmem:[%s2712_s10 + $0x20] sm:$0xff]  ;;  %v1720_v3 = vld [vmem:[%s2746_s29 + $0x48] sm:$0xff] }
 0x25b   :  { %2760 = vst [vmem:[#allocation10_spill] sm:$0xff] %v2343_v1 }
 0x267   :  { %v498_v12 = vpop.f32.mrf.mxu3 }
 0x268   :  { %v501_v15 = vadd.f32 %v498_v12, %v453_v6  ;;  %v1722_v6 = vld [vmem:[%s2746_s29 + $0x58] sm:$0xff]  ;;  %v1724_v12 = vld [vmem:[%s2746_s29 + $0x68] sm:$0xff] }
 0x269   :  { %v706_v31 = vsel %vm159_vm0, %v1722_v6, -inf  ;;  %v1725_v6 = vld [vmem:[%s2746_s29 + $0x70] sm:$0xff] }
 0x26a   :  { %v505_v20 = vmul.f32 %v2268_v9, %v501_v15  ;;  %v1726_v15 = vld [vmem:[%s2746_s29 + $0x78] sm:$0xff] }
 0x26c   :  { %v2277_v22 = vadd.f32 %v2273_v19, %v505_v20  ;;  %v705_v20 = vsel %vm159_vm0, %v1720_v3, -inf }
 0x26e   :  { %1710 = vmatpush.msk.msrb.mxu2 %vm518_vm8, %v2277_v22  ;;  %1712 = vmatpush.msk.msrb.mxu0 %vm518_vm8, %v2277_v22 }
 0x26f   :  { %1716 = vmatpush.msk.msrb.mxu3 %vm518_vm8, %v2277_v22  ;;  %1711 = vmatmul.msk.f32.vlgmr.msrb.gmra.mxu2 %vm514_vm9, %v2282_v23 }
 0x270   :  { %1713 = vmatmul.msk.f32.vlgmr.msrb.gmra.mxu0 %vm514_vm9, %v2287_v32  ;;  %1717 = vmatmul.msk.f32.vlgmr.msrb.gmra.mxu3 %vm514_vm9, %v2292_v33  ;;  %v2383_v32 = vld [vmem:[%s2712_s10 + $0x40] sm:$0xff] }
 0x271   :  { %599 = vmatpush.msra.mxu2 %v2301_v34  ;;  %645 = vmatpush.msra.mxu0 %v2306_v35  ;;  %v1723_v35 = vld [vmem:[%s2746_s29 + $0x60] sm:$0xff]  ;;  %v702_v34 = vsel %vm159_vm0, %v1725_v6, -inf  ;;  %v2406_v6 = vld [vmem:[%s2712_s10 + $0x98] sm:$0xff] }
 0x272   :  { %583 = vmatpush.msrb.mxu1 %v2383_v32 }
 0x273   :  { %600 = vmatpush.msra.mxu2 %v2319_v36  ;;  %646 = vmatpush.msra.mxu0 %v2324_v52  ;;  %v1719_v52 = vld [vmem:[%s2746_s29 + $0x40] sm:$0xff]  ;;  %v1721_v36 = vld [vmem:[%s2746_s29 + $0x50] sm:$0xff]  ;;  %s1824_s29 = smov 96  }
 0x275   :  { %601 = vmatpush.msra.mxu2 %v2331_v53  ;;  %647 = vmatpush.msra.mxu0 %v2336_v54  ;;  %v709_v53 = vsel %vm159_vm0, %v1726_v15, -inf  ;;  %v700_v15 = vsel %vm159_vm0, %v1723_v35, -inf }
 0x276   :  { %v710_v3 = vmax.f32 %v706_v31, %v709_v53  ;;  %v2388_v31 = vld [vmem:[%s2712_s10 + $0x18] sm:$0xff]  ;;  %v2401_v53 = vld [vmem:[%s2712_s10 + $0x10] sm:$0xff] }
 0x277   :  { %602 = vmatpush.msra.mxu2 %v2343_v1  ;;  %v707_v1 = vsel %vm159_vm0, %v1724_v12, -inf  ;;  %v699_v12 = vsel %vm159_vm0, %v1721_v36, -inf }
 0x278   :  { %v708_v54 = vmax.f32 %v705_v20, %v707_v1  ;;  %v698_v1 = vsel %vm159_vm0, %v1719_v52, -inf  ;;  %v2393_v52 = vld [vmem:[%s2712_s10 + $0xa0] sm:$0xff]  ;;  %v703_v35 = vmax.f32 %v699_v12, %v702_v34  ;;  %v2411_v34 = vld [vmem:[%s2712_s10 + $0x8] sm:$0xff] }
 0x279   :  { %v701_v20 = vmax.f32 %v698_v1, %v700_v15  ;;  %603 = vmatpush.msra.mxu2 %v2388_v31  ;;  %648 = vmatpush.msra.mxu0 %v2393_v52  ;;  %v2432_v12 = vld [vmem:[%s2712_s10 + $0x88] sm:$0xff] }
 0x27a   :  { %v711_v36 = vmax.f32 %v708_v54, %v710_v3  ;;  %v2417_v54 = vld [vmem:[%s2712_s10 + $0x90] sm:$0xff]  ;;  %v2427_v3 = vld [vmem:[%s2712_s10] sm:$0xff] }
 0x27b   :  { %v704_v1 = vmax.f32 %v701_v20, %v703_v35  ;;  %604 = vmatpush.msra.mxu2 %v2401_v53  ;;  %649 = vmatpush.msra.mxu0 %v2406_v6 }
 0x27c   :  { %726 = vmatpush.msra.mxu3 %v711_v36  ;;  %746 = vmatpush.msra.mxu1 %v711_v36 }
 0x27d   :  { %605 = vmatpush.msra.mxu2 %v2411_v34  ;;  %650 = vmatpush.msra.mxu0 %v2417_v54 }
 0x27e   :  { %727 = vmatpush.msra.mxu3 %v704_v1  ;;  %747 = vmatpush.msra.mxu1 %v704_v1 }
 0x27f   :  { %1727 = vmatmul.msk.f32.vlgmr.msra.gmra.mxu3 %vm159_vm0, %v1989_v24  ;;  %606 = vmatpush.msra.mxu2 %v2427_v3  ;;  %v2438_v24 = vld [vmem:[%s2712_s10 + $0x80] sm:$0xff] }
 0x280   :  { %792 = vmatpush.msrb.mxu3 %v1983_v21  ;;  %651 = vmatpush.msra.mxu0 %v2432_v12 }
 0x281   :  { %769 = vmatpush.msrb.mxu2 %v1977_v18 }
 0x282   :  { %793 = vmatpush.msrb.mxu3 %v2015_v28  ;;  %652 = vmatpush.msra.mxu0 %v2438_v24  ;;  %v2476_v28 = vld [vmem:[%s2711_s11] ss:$0 sm:$0xff]  ;;  %s1823_s11 = smov 112  }
 0x283   :  { %770 = vmatpush.msrb.mxu2 %v2010_v27 }
 0x284   :  { %812 = vmatpush.msrb.mxu0 %v711_v36 }
 0x286   :  { %813 = vmatpush.msrb.mxu0 %v704_v1 }
 0x2ed   :  { %v562_v15 = vpop.f32.mrf.mxu0 }
 0x2ee   :  { %1714 = vmatmul.msk.f32.vlgmr.msrb.gmra.mxu1 %vm408_vm7, %v562_v15 }
 0x2ef   :  { %835 = vmatpush.msrb.mxu1 %v2022_v29 }
 0x2f1   :  { %836 = vmatpush.msrb.mxu1 %v2028_v30 }
 0x2f2   :  { %v539_v21 = vpop.f32.mrf.mxu2 }
 0x2f3   :  { %1715 = vmatmul.msk.f32.vlgmr.msra.gmra.mxu2 %vm408_vm7, %v539_v21  ;;  %v631_v20 = vpop.f32.mrf.mxu3 }
 0x2f4   :  { %1718 = vmatmul.msk.f32.vlgmr.msra.gmra.mxu0 %vm408_vm7, %v631_v20 }
 0x2f5   :  { %935 = vmatpush.msra.mxu0 %v2055_v62  ;;  %v513_v62 = vadd.f32 %v2476_v28, %v2277_v22 }
 0x2f6   :  { %1728 = vmatmul.msk.f32.vlgmr.msra.gmra.mxu1 %vm159_vm0, %v1994_v25 }
 0x2f7   :  { %958 = vmatpush.msra.mxu1 %v2060_v63  ;;  %936 = vmatpush.msra.mxu0 %v2065_v0 }
 0x2f9   :  { %959 = vmatpush.msra.mxu1 %v2072_v2  ;;  %937 = vmatpush.msra.mxu0 %v2077_v4 }
 0x2fb   :  { %960 = vmatpush.msra.mxu1 %v2082_v5  ;;  %938 = vmatpush.msra.mxu0 %v2089_v7 }
 0x2fc   :  { %1731 = vmatmul.msk.f32.vlgmr.msrb.gmra.mxu0 %vm159_vm0, %v2003_v26 }
 0x2fd   :  { %961 = vmatpush.msra.mxu1 %v2094_v8  ;;  %939 = vmatpush.msra.mxu0 %v2101_v10 }
 0x2ff   :  { %962 = vmatpush.msra.mxu1 %v2106_v11  ;;  %940 = vmatpush.msra.mxu0 %v2113_v13 }
 0x301   :  { %963 = vmatpush.msra.mxu1 %v2118_v14  ;;  %941 = vmatpush.msra.mxu0 %v2125_v16 }
 0x302   :  { %v729_v18 = vpop.f32.mrf.mxu3 }
 0x303   :  { %964 = vmatpush.msra.mxu1 %v2130_v17  ;;  %942 = vmatpush.msra.mxu0 %v2181_v45 }
 0x304   :  { %1730 = vmatmul.msk.f32.vlgmr.msrb.gmra.mxu3 %vm159_vm0, %v729_v18 }
 0x305   :  { %965 = vmatpush.msra.mxu1 %v2186_v46 }
 0x36b   :  { %v585_v25 = vpop.f32.mrf.mxu1 }
 0x371   :  { %v654_v26 = vpop.f32.mrf.mxu0 }
 0x373   :  { %v749_v27 = vpop.f32.mrf.mxu1 }
 0x374   :  { %1729 = vmatmul.msk.f32.vlgmr.msrb.gmra.mxu2 %vm159_vm0, %v749_v27 }
 0x376   :  { %v608_v29 = vpop.f32.mrf.mxu2 }
 0x377   :  { %v609_v30 = vadd.f32 %v608_v29, %v585_v25 }
 0x379   :  { %v657_v63 = vadd.f32 %v654_v26, %v609_v30  ;;  %v815_v0 = vpop.f32.mrf.mxu0 }
 0x37a   :  { %1732 = vmatmul.msk.f32.vlgmr.msrb.gmra.mxu1 %vm159_vm0, %v815_v0 }
 0x37b   :  { %v658_v2 = vadd.f32 %v657_v63, %v513_v62  ;;  %1071 = vmatpush.msrb.mxu1 %v2226_v55 }
 0x37d   :  { %670 = vrot.lane.b32.xlu1 %v658_v2, %s1822_s8  ;;  %662 = vrot.lane.b32.xlu0 %v658_v2, %s1823_s11  ;;  %660 = vst.msk [vmem:[#allocation2] sm:$0x1] %vm659_vm10, %v658_v2 }
 0x37e   :  { %675 = vst.msk [vmem:[#allocation2 + $0x3] sm:$0x2] %vm674_vm11, %v658_v2  ;;  %1072 = vmatpush.msrb.mxu1 %v2231_v56 }
 0x37f   :  { %680 = vst.msk [vmem:[#allocation2 + $0x6] sm:$0x4] %vm679_vm12, %v658_v2 }
 0x380   :  { %685 = vst.msk [vmem:[#allocation2 + $0x9] sm:$0x8] %vm684_vm13, %v658_v2  ;;  %1073 = vmatpush.msrb.mxu1 %v2237_v57 }
 0x382   :  { %1074 = vmatpush.msrb.mxu1 %v2243_v58 }
 0x384   :  { %1075 = vmatpush.msrb.mxu1 %v2249_v59 }
 0x385   :  { %666 = vrot.lane.b32.xlu0 %v658_v2, %s1824_s29 }
 0x386   :  { %1076 = vmatpush.msrb.mxu1 %v2255_v60 }
 0x387   :  { %v795_v7 = vpop.f32.mrf.mxu3 }
 0x388   :  { %1077 = vmatpush.msrb.mxu1 %v2261_v61 }
 0x38a   :  { %1078 = vmatpush.msrb.mxu1 %v2383_v32 }
 0x3ef   :  { %v671_v4 = vpop.permute.xlu1 %670  ;;  %v663_v5 = vpop.permute.xlu0 %662 }
 0x3f0   :  { %673 = vst.msk [vmem:[#allocation2 + $0x3] sm:$0x1] %vm659_vm10, %v671_v4 }
 0x3f1   :  { %678 = vst.msk [vmem:[#allocation2 + $0x6] sm:$0x2] %vm674_vm11, %v671_v4 }
 0x3f2   :  { %683 = vst.msk [vmem:[#allocation2 + $0x9] sm:$0x4] %vm679_vm12, %v671_v4 }
 0x3f3   :  { %688 = vst.msk [vmem:[#allocation2 + $0xc] sm:$0x8] %vm684_vm13, %v671_v4 }
 0x3f4   :  { %665 = vst.msk [vmem:[#allocation2 + $0x1] sm:$0x1] %vm659_vm10, %v663_v5 }
 0x3f5   :  { %676 = vst.msk [vmem:[#allocation2 + $0x4] sm:$0x2] %vm674_vm11, %v663_v5 }
 0x3f6   :  { %681 = vst.msk [vmem:[#allocation2 + $0x7] sm:$0x4] %vm679_vm12, %v663_v5 }
 0x3f7   :  { %686 = vst.msk [vmem:[#allocation2 + $0xa] sm:$0x8] %vm684_vm13, %v663_v5  ;;  %v772_v8 = vpop.f32.mrf.mxu2  ;;  %v667_v10 = vpop.permute.xlu0 %666 }
 0x3f8   :  { %v796_v11 = vadd.f32 %v795_v7, %v772_v8  ;;  %669 = vst.msk [vmem:[#allocation2 + $0x2] sm:$0x1] %vm659_vm10, %v667_v10  ;;  %v838_v13 = vpop.f32.mrf.mxu1 }
 0x3f9   :  { %677 = vst.msk [vmem:[#allocation2 + $0x5] sm:$0x2] %vm674_vm11, %v667_v10 }
 0x3fa   :  { %682 = vst.msk [vmem:[#allocation2 + $0x8] sm:$0x4] %vm679_vm12, %v667_v10  ;;  %v841_v14 = vadd.f32 %v838_v13, %v796_v11 }
 0x3fb   :  { %687 = vst.msk [vmem:[#allocation2 + $0xb] sm:$0x8] %vm684_vm13, %v667_v10  ;;  %v2761_v10 = vmov -1.0  }
 0x3fc   :  { %v842_v16 = vmul.f32 %v2037_v37, %v841_v14 }
 0x3fe   :  { %v843_v17 = vadd.f32 %v2042_v40, %v842_v16 }
 0x400   :  { %v845_v45 = vmul.f32 0.70710677, %v843_v17  ;;  %v2510_v46 = vld [vmem:[#allocation2] sm:$0xff]  ;;  %v844_v14 = vmul.f32 0.5, %v843_v17 }
 0x401   :  { %v1191_v55 = vsel %vm159_vm0, %v2510_v46, 0.0 }
 0x402   :  { %v848_v56 = vand.u32 2147483647, %v845_v45  ;;  %v2514_v57 = vld [vmem:[#allocation2 + $0x8] sm:$0xff]  ;;  %1192 = vadd.xlane.f32.xlu1 %v1191_v55  ;;  %vm846_vm3 = vcmp.ge.f32.partialorder %v845_v45, 0.0 }
 0x403   :  { %v1194_v58 = vsel %vm159_vm0, %v2514_v57, 0.0  ;;  %v847_v11 = vsel %vm846_vm3, 1.0, %v2761_v10 }
 0x404   :  { %v849_v59 = vmul.f32 0.3275911, %v848_v56  ;;  %1195 = vadd.xlane.f32.xlu2 %v1194_v58  ;;  %v875_v21 = vsub.f32 0.0, %v848_v56 }
 0x406   :  { %v850_v60 = vadd.f32 1.0, %v849_v59  ;;  %v876_v26 = vmul.f32 %v875_v21, %v848_v56 }
 0x408   :  { %1795 = vrcp.f32 %v850_v60  ;;  %v862_v22 = vand.u32 2147483648, %v850_v60  ;;  %v860_v36 = vand.u32 2147483647, %v850_v60  ;;  %vm856_vm15 = vweird.f32 %v850_v60 }
 0x409   :  { %v877_v30 = vmul.f32 1.442695, %v876_v26 }
 0x40a   :  { %v863_v1 = vor.u32 1.1754944e-38, %v862_v22  ;;  %vm861_vm2 = vcmp.eq.f32.partialorder %v860_v36, 8.507059e+37 }
 0x40b   :  { %1797 = vpow2.f32 %v877_v30 }
 0x40e   :  { %v1796_v37 = vpop.eup %1795 }
 0x40f   :  { %v852_v61 = vmul.f32 %v1796_v37, %v850_v60  ;;  %vm857_vm14 = vweird.f32 %v1796_v37 }
 0x410   :  { %vm858_vm1 = vmor %vm856_vm15, %vm857_vm14 }
 0x411   :  { %v853_v40 = vsub.f32 1.0, %v852_v61  ;;  %v1798_v5 = vpop.eup %1797 }
 0x413   :  { %v854_v32 = vmul.f32 %v1796_v37, %v853_v40 }
 0x415   :  { %v855_v35 = vadd.f32 %v1796_v37, %v854_v32 }
 0x417   :  { %v859_v15 = vsel %vm858_vm1, %v1796_v37, %v855_v35 }
 0x418   :  { %v864_v20 = vsel %vm861_vm2, %v863_v1, %v859_v15 }
 0x419   :  { %v866_v18 = vmul.f32 1.0614054, %v864_v20 }
 0x41b   :  { %v867_v25 = vadd.f32 -1.4531521, %v866_v18 }
 0x41d   :  { %v868_v27 = vmul.f32 %v867_v25, %v864_v20 }
 0x41f   :  { %v869_v29 = vadd.f32 1.4214138, %v868_v27 }
 0x421   :  { %v870_v62 = vmul.f32 %v869_v29, %v864_v20 }
 0x423   :  { %v871_v63 = vadd.f32 -0.28449672, %v870_v62 }
 0x425   :  { %v872_v0 = vmul.f32 %v871_v63, %v864_v20 }
 0x427   :  { %v873_v2 = vadd.f32 0.2548296, %v872_v0 }
 0x429   :  { %v874_v4 = vmul.f32 %v873_v2, %v864_v20 }
 0x42b   :  { %v879_v7 = vmul.f32 %v1798_v5, %v874_v4 }
 0x42d   :  { %v880_v8 = vsub.f32 1.0, %v879_v7 }
 0x42f   :  { %v881_v13 = vmul.f32 %v880_v8, %v847_v11  ;;  %v2555_v11 = vld [vmem:[%s2714_s12] ss:$0 sm:$0xff] }
 0x431   :  { %v882_v16 = vadd.f32 1.0, %v881_v13 }
 0x433   :  { %v883_v55 = vmul.f32 %v882_v16, %v844_v14  ;;  %v1183_v14 = vld [vmem:[%s2716_s15 + $0x8] sm:$0xff] }
 0x435   :  { %899 = vmatpush.msra.mxu2 %v883_v55  ;;  %919 = vmatpush.msra.mxu3 %v883_v55 }
 0x436   :  { %1733 = vmatmul.msk.f32.vlgmr.msra.gmra.mxu2 %vm361_vm6, %v2142_v38  ;;  %1734 = vmatmul.msk.f32.vlgmr.msra.gmra.mxu3 %vm361_vm6, %v2147_v39  ;;  %v1825_v38 = vmov 16.0  }
 0x437   :  { %985 = vmatpush.msrb.mxu2 %v883_v55  ;;  %1001 = vmatpush.msrb.mxu3 %v2152_v41  ;;  %1799 = vrcp.f32 %v1825_v38  ;;  %v2763_v55 = vld [vmem:[#allocation4_spill] sm:$0xff] }
 0x439   :  { %1002 = vmatpush.msrb.mxu3 %v2161_v42 }
 0x43b   :  { %1003 = vmatpush.msrb.mxu3 %v2167_v43 }
 0x43d   :  { %1004 = vmatpush.msrb.mxu3 %v2191_v47  ;;  %v1800_v39 = vpop.eup %1799 }
 0x43e   :  { %1737 = vmatmul.msk.f32.vlgmr.msrb.gmra.mxu2 %vm361_vm6, %v2173_v44  ;;  %v1198_v41 = vmul.f32 16.0, %v1800_v39  ;;  %vm1202_vm4 = vweird.f32 %v1800_v39 }
 0x43f   :  { %1005 = vmatpush.msrb.mxu3 %v2198_v48 }
 0x440   :  { %v1199_v42 = vsub.f32 1.0, %v1198_v41  ;;  %v2765_v41 = vld [vmem:[#allocation6_spill] sm:$0xff] }
 0x441   :  { %1006 = vmatpush.msrb.mxu3 %v2204_v49 }
 0x442   :  { %v1200_v17 = vmul.f32 %v1800_v39, %v1199_v42  ;;  %v2766_v42 = vld [vmem:[#allocation7_spill] sm:$0xff] }
 0x443   :  { %1007 = vmatpush.msrb.mxu3 %v2210_v50 }
 0x444   :  { %v1201_v43 = vadd.f32 %v1800_v39, %v1200_v17  ;;  %v2767_v17 = vld [vmem:[#allocation8_spill] sm:$0xff] }
 0x445   :  { %1008 = vmatpush.msrb.mxu3 %v2217_v51 }
 0x446   :  { %v2533_v47 = vsel %vm1202_vm4, %v1800_v39, %v1201_v43 }
 0x475   :  { %v1193_v45 = vpop.xlane.xlu1 %1192 }
 0x476   :  { %v1204_v44 = vmul.f32 %v2533_v47, %v1193_v45 }
 0x477   :  { %v1196_v48 = vpop.xlane.xlu2 %1195 }
 0x478   :  { %v1205_v49 = vmul.f32 %v2533_v47, %v1196_v48  ;;  %v1206_v50 = vsub.f32 %v2510_v46, %v1204_v44  ;;  %v2768_v44 = vld [vmem:[#allocation9_spill] sm:$0xff]  ;;  %v2769_v48 = vld [vmem:[#allocation10_spill] sm:$0xff] }
 0x47a   :  { %v2539_v51 = vsub.f32 %v2514_v57, %v1205_v49  ;;  %v1208_v56 = vmul.f32 %v1206_v50, %v1206_v50 }
 0x47c   :  { %v1209_v58 = vmul.f32 %v2539_v51, %v2539_v51  ;;  %v1210_v59 = vsel %vm159_vm0, %v1208_v56, 0.0 }
 0x47d   :  { %1211 = vadd.xlane.f32.xlu2 %v1210_v59 }
 0x47e   :  { %v1213_v60 = vsel %vm159_vm0, %v1209_v58, 0.0 }
 0x47f   :  { %1214 = vadd.xlane.f32.xlu0 %v1213_v60 }
 0x4b9   :  { %v901_v37 = vpop.f32.mrf.mxu2  ;;  %v921_v61 = vpop.f32.mrf.mxu3 }
 0x4ba   :  { %1735 = vmatmul.msk.f32.vlgmr.msra.gmra.mxu0 %vm408_vm7, %v921_v61  ;;  %1736 = vmatmul.msk.f32.vlgmr.msra.gmra.mxu1 %vm408_vm7, %v901_v37 }
 0x4c1   :  { %v987_v46 = vpop.f32.mrf.mxu2 }
 0x4c2   :  { %1738 = vmatmul.msk.f32.vlgmr.msrb.gmra.mxu3 %vm408_vm7, %v987_v46 }
 0x4f0   :  { %v1212_v57 = vpop.xlane.xlu2 %1211 }
 0x4f1   :  { %v1216_v40 = vmul.f32 %v1212_v57, %v2533_v47 }
 0x4f2   :  { %v1215_v32 = vpop.xlane.xlu0 %1214 }
 0x4f3   :  { %v1218_v22 = vadd.f32 1e-05, %v1216_v40  ;;  %v1217_v36 = vmul.f32 %v1215_v32, %v2533_v47 }
 0x4f5   :  { %1801 = vrsqrt.f32 %v1218_v22  ;;  %v1219_v35 = vadd.f32 1e-05, %v1217_v36  ;;  %vm1226_vm6 = vweird.f32 %v1218_v22 }
 0x4f7   :  { %1803 = vrsqrt.f32 %v1219_v35  ;;  %vm1236_vm1 = vweird.f32 %v1219_v35 }
 0x4fb   :  { %v1802_v1 = vpop.eup %1801 }
 0x4fc   :  { %v1221_v15 = vmul.f32 %v1802_v1, %v1218_v22  ;;  %vm1227_vm5 = vweird.f32 %v1802_v1 }
 0x4fd   :  { %v1804_v20 = vpop.eup %1803  ;;  %vm1228_vm14 = vmor %vm1226_vm6, %vm1227_vm5 }
 0x4fe   :  { %v1222_v21 = vmul.f32 %v1802_v1, %v1221_v15  ;;  %v1231_v18 = vmul.f32 %v1804_v20, %v1219_v35  ;;  %vm1237_vm15 = vweird.f32 %v1804_v20 }
 0x4ff   :  { %vm1238_vm2 = vmor %vm1236_vm1, %vm1237_vm15 }
 0x500   :  { %v1223_v25 = vmul.f32 0.5, %v1222_v21  ;;  %v1232_v26 = vmul.f32 %v1804_v20, %v1231_v18 }
 0x502   :  { %v1224_v27 = vsub.f32 1.5, %v1223_v25  ;;  %v1233_v63 = vmul.f32 0.5, %v1232_v26 }
 0x504   :  { %v1225_v0 = vmul.f32 %v1802_v1, %v1224_v27  ;;  %v1234_v7 = vsub.f32 1.5, %v1233_v63 }
 0x506   :  { %v1229_v8 = vsel %vm1228_vm14, %v1802_v1, %v1225_v0  ;;  %v1235_v16 = vmul.f32 %v1804_v20, %v1234_v7 }
 0x507   :  { %v1240_v13 = vmul.f32 %v1229_v8, %v1206_v50 }
 0x508   :  { %v1239_v39 = vsel %vm1238_vm2, %v1804_v20, %v1235_v16 }
 0x509   :  { %v1245_v38 = vmul.f32 %v2555_v11, %v1240_v13  ;;  %v1241_v45 = vmul.f32 %v1239_v39, %v2539_v51 }
 0x50b   :  { %v1246_v49 = vmul.f32 %v2555_v11, %v1241_v45 }
 0x537   :  { %v944_v29 = vpop.f32.mrf.mxu0  ;;  %v967_v30 = vpop.f32.mrf.mxu1 }
 0x538   :  { %v968_v62 = vadd.f32 %v967_v30, %v944_v29 }
 0x545   :  { %v1010_v2 = vpop.f32.mrf.mxu3 }
 0x546   :  { %v1013_v4 = vadd.f32 %v1010_v2, %v968_v62 }
 0x548   :  { %v1014_v5 = vmul.f32 %v2268_v9, %v1013_v4  ;;  %v1182_v9 = vld [vmem:[%s2716_s15] sm:$0xff] }
 0x54a   :  { %v1015_v10 = vadd.f32 %v2273_v19, %v1014_v5  ;;  %v2762_v19 = vld [vmem:[#allocation3_spill] sm:$0xff] }
 0x54c   :  { %1739 = vmatpush.msk.msra.mxu2 %vm518_vm8, %v1015_v10  ;;  %1741 = vmatpush.msk.msrb.mxu0 %vm518_vm8, %v1015_v10  ;;  %v1016_v51 = vadd.f32 %v2476_v28, %v1015_v10  ;;  %v2616_v28 = vld [vmem:[%s2717_s14] sm:$0x7] }
 0x54d   :  { %1745 = vmatpush.msk.msra.mxu3 %vm518_vm8, %v1015_v10  ;;  %1740 = vmatmul.msk.f32.vlgmr.msra.gmra.mxu2 %vm514_vm9, %v2282_v23  ;;  %v2577_v23 = vld [vmem:[%s2715_s13] ss:$0 sm:$0xff] }
 0x54e   :  { %1746 = vmatmul.msk.f32.vlgmr.msra.gmra.mxu3 %vm514_vm9, %v2292_v33  ;;  %1742 = vmatmul.msk.f32.vlgmr.msrb.gmra.mxu0 %vm514_vm9, %v2762_v19  ;;  %v2764_v33 = vld [vmem:[#allocation5_spill] sm:$0xff]  ;;  %v1250_v43 = vadd.f32 %v2577_v23, %v1245_v38  ;;  %v1251_v50 = vadd.f32 %v2577_v23, %v1246_v49 }
 0x54f   :  { %1272 = vmatpush.msrb.mxu3 %v1183_v14  ;;  %1094 = vmatpush.msrb.mxu2 %v2763_v55 }
 0x550   :  { %1137 = vmatpush.msra.mxu0 %v2764_v33 }
 0x551   :  { %1273 = vmatpush.msrb.mxu3 %v1182_v9  ;;  %1095 = vmatpush.msrb.mxu2 %v2765_v41 }
 0x552   :  { %1138 = vmatpush.msra.mxu0 %v2766_v42 }
 0x553   :  { %1096 = vmatpush.msrb.mxu2 %v2767_v17 }
 0x554   :  { %1139 = vmatpush.msra.mxu0 %v2768_v44 }
 0x555   :  { %1097 = vmatpush.msrb.mxu2 %v2769_v48 }
 0x556   :  { %1748 = vmatmul.msk.f32.vlgmr.msrb.gmra.mxu3 %vm159_vm0, %v1250_v43  ;;  %1140 = vmatpush.msra.mxu0 %v2393_v52 }
 0x557   :  { %1098 = vmatpush.msrb.mxu2 %v2388_v31 }
 0x558   :  { %1141 = vmatpush.msra.mxu0 %v2406_v6 }
 0x559   :  { %1099 = vmatpush.msrb.mxu2 %v2401_v53 }
 0x55a   :  { %1142 = vmatpush.msra.mxu0 %v2417_v54 }
 0x55b   :  { %1100 = vmatpush.msrb.mxu2 %v2411_v34 }
 0x55c   :  { %1143 = vmatpush.msra.mxu0 %v2432_v12 }
 0x55d   :  { %1101 = vmatpush.msrb.mxu2 %v2427_v3 }
 0x55e   :  { %1749 = vmatmul.msk.f32.gmra.mxu3 %vm159_vm0, %v1251_v50  ;;  %1144 = vmatpush.msra.mxu0 %v2438_v24 }
 0x5cb   :  { %v1057_v31 = vpop.f32.mrf.mxu0 }
 0x5cc   :  { %1743 = vmatmul.msk.f32.vlgmr.msrb.gmra.mxu1 %vm408_vm7, %v1057_v31 }
 0x5d0   :  { %v1037_v52 = vpop.f32.mrf.mxu2 }
 0x5d1   :  { %v1123_v6 = vpop.f32.mrf.mxu3  ;;  %1744 = vmatmul.msk.f32.vlgmr.msrb.gmra.mxu2 %vm408_vm7, %v1037_v52 }
 0x5d2   :  { %1747 = vmatmul.msk.f32.vlgmr.msra.gmra.mxu0 %vm408_vm7, %v1123_v6  ;;  %vm1311_vm7 = vcmask 124928  }
 0x5d9   :  { %v1275_v53 = vpop.f32.mrf.mxu3 }
 0x5e1   :  { %v1278_v34 = vpop.f32.mrf.mxu3 }
 0x5e2   :  { %1750 = vmatpush.xpose.msk.msra.mxu1 %vm159_vm0, %v1278_v34  ;;  %v1769_v30 = vpack.i.bf16 %v1275_v53, %v1278_v34 }
 0x5e6   :  { %1751 = vmatpush.xpose.msk.msra.mxu1 %vm159_vm0, %v1275_v53 }
 0x5e9   :  { %1752 = vmatmul.msk.f32.vlgmr.msra.gmra.mxu1 %vm159_vm0, %v2616_v28 }
 0x5ea   :  { %1503 = vmatpush.msrb.mxu1 %v1183_v14 }
 0x5ec   :  { %1504 = vmatpush.msrb.mxu1 %v1182_v9 }
 0x649   :  { %v1080_v54 = vpop.f32.mrf.mxu1 }
 0x64f   :  { %v1146_v12 = vpop.f32.mrf.mxu0 }
 0x654   :  { %v1103_v3 = vpop.f32.mrf.mxu2 }
 0x655   :  { %v1104_v24 = vadd.f32 %v1103_v3, %v1080_v54 }
 0x657   :  { %v1149_v56 = vadd.f32 %v1146_v12, %v1104_v24  ;;  %v1185_v24 = vld [vmem:[%s2718_s16 + $0x8] sm:$0xff] }
 0x658   :  { %1385 = vmatpush.msrb.mxu0 %v1185_v24 }
 0x659   :  { %v1150_v58 = vadd.f32 %v1149_v56, %v1016_v51 }
 0x65b   :  { %1151 = vst.msk [vmem:[#allocation2 + $0x10] sm:$0x1] %vm659_vm10, %v1150_v58  ;;  %1153 = vrot.lane.b32.xlu2 %v1150_v58, %s1823_s11 }
 0x65c   :  { %1165 = vst.msk [vmem:[#allocation2 + $0x13] sm:$0x2] %vm674_vm11, %v1150_v58 }
 0x65d   :  { %1169 = vst.msk [vmem:[#allocation2 + $0x16] sm:$0x4] %vm679_vm12, %v1150_v58 }
 0x65e   :  { %1173 = vst.msk [vmem:[#allocation2 + $0x19] sm:$0x8] %vm684_vm13, %v1150_v58 }
 0x663   :  { %1157 = vrot.lane.b32.xlu2 %v1150_v58, %s1824_s29 }
 0x666   :  { %v1307_v20 = vpop.f32.mrf.mxu1 }
 0x667   :  { %v1310_v27 = vmul.f32 0.25, %v1307_v20  ;;  %v1788_v20 = vld [vmem:[%s2719_s17] ss:$0 sm:$0xff] }
 0x669   :  { %v1312_v29 = vsel %vm1311_vm7, %v1310_v27, -inf }
 0x66b   :  { %1161 = vrot.lane.b32.xlu2 %v1150_v58, %s1822_s8 }
 0x6b5   :  { %v1154_v59 = vpop.permute.xlu2 %1153 }
 0x6b6   :  { %1156 = vst.msk [vmem:[#allocation2 + $0x11] sm:$0x1] %vm659_vm10, %v1154_v59 }
 0x6b7   :  { %1166 = vst.msk [vmem:[#allocation2 + $0x14] sm:$0x2] %vm674_vm11, %v1154_v59 }
 0x6b8   :  { %1170 = vst.msk [vmem:[#allocation2 + $0x17] sm:$0x4] %vm679_vm12, %v1154_v59 }
 0x6b9   :  { %1174 = vst.msk [vmem:[#allocation2 + $0x1a] sm:$0x8] %vm684_vm13, %v1154_v59 }
 0x6bd   :  { %v1158_v60 = vpop.permute.xlu2 %1157 }
 0x6be   :  { %1160 = vst.msk [vmem:[#allocation2 + $0x12] sm:$0x1] %vm659_vm10, %v1158_v60 }
 0x6bf   :  { %1167 = vst.msk [vmem:[#allocation2 + $0x15] sm:$0x2] %vm674_vm11, %v1158_v60 }
 0x6c0   :  { %1171 = vst.msk [vmem:[#allocation2 + $0x18] sm:$0x4] %vm679_vm12, %v1158_v60 }
 0x6c1   :  { %1175 = vst.msk [vmem:[#allocation2 + $0x1b] sm:$0x8] %vm684_vm13, %v1158_v60 }
 0x6c5   :  { %v1162_v37 = vpop.permute.xlu2 %1161 }
 0x6c6   :  { %1164 = vst.msk [vmem:[#allocation2 + $0x13] sm:$0x1] %vm659_vm10, %v1162_v37 }
 0x6c7   :  { %1168 = vst.msk [vmem:[#allocation2 + $0x16] sm:$0x2] %vm674_vm11, %v1162_v37 }
 0x6c8   :  { %1172 = vst.msk [vmem:[#allocation2 + $0x19] sm:$0x4] %vm679_vm12, %v1162_v37 }
 0x6c9   :  { %1176 = vst.msk [vmem:[#allocation2 + $0x1c] sm:$0x8] %vm684_vm13, %v1162_v37 }
 0x6ce   :  { %v1433_v61 = vld [vmem:[#allocation2 + $0x10] sm:$0xff] }
 0x6cf   :  { %v1435_v46 = vsel %vm159_vm0, %v1433_v61, 0.0 }
 0x6d0   :  { %v1434_v57 = vld [vmem:[#allocation2 + $0x18] sm:$0xff]  ;;  %1436 = vadd.xlane.f32.xlu1 %v1435_v46 }
 0x6d1   :  { %v1438_v40 = vsel %vm159_vm0, %v1434_v57, 0.0 }
 0x6d2   :  { %1439 = vadd.xlane.f32.xlu2 %v1438_v40 }
 0x743   :  { %v1437_v22 = vpop.xlane.xlu1 %1436 }
 0x744   :  { %v1441_v32 = vmul.f32 %v1437_v22, %v2533_v47 }
 0x745   :  { %v1440_v36 = vpop.xlane.xlu2 %1439 }
 0x746   :  { %v1442_v35 = vmul.f32 %v1440_v36, %v2533_v47  ;;  %v1443_v1 = vsub.f32 %v1433_v61, %v1441_v32  ;;  %v1184_v36 = vld [vmem:[%s2718_s16] sm:$0xff] }
 0x747   :  { %1386 = vmatpush.msrb.mxu0 %v1184_v36 }
 0x748   :  { %v1444_v15 = vsub.f32 %v1434_v57, %v1442_v35  ;;  %v1445_v21 = vmul.f32 %v1443_v1, %v1443_v1 }
 0x749   :  { %1609 = vmatpush.msra.mxu0 %v1185_v24 }
 0x74a   :  { %v1446_v18 = vmul.f32 %v1444_v15, %v1444_v15  ;;  %v1447_v25 = vsel %vm159_vm0, %v1445_v21, 0.0 }
 0x74b   :  { %1448 = vadd.xlane.f32.xlu0 %v1447_v25  ;;  %1610 = vmatpush.msra.mxu0 %v1184_v36 }
 0x74c   :  { %v1450_v26 = vsel %vm159_vm0, %v1446_v18, 0.0 }
 0x74d   :  { %1451 = vadd.xlane.f32.xlu1 %v1450_v26 }
 0x753   :  { %1313 = vmax.xlane.f32.xlu0 %v1312_v29 }
 0x767   :  { %1770 = vrot.lane.b32.xlu0 %v1769_v30, %s1823_s11 }
 0x7be   :  { %v1449_v62 = vpop.xlane.xlu0 %1448 }
 0x7bf   :  { %v1453_v63 = vmul.f32 %v1449_v62, %v2533_v47 }
 0x7c0   :  { %v1452_v0 = vpop.xlane.xlu1 %1451 }
 0x7c1   :  { %v1455_v2 = vadd.f32 1e-05, %v1453_v63  ;;  %v1454_v4 = vmul.f32 %v1452_v0, %v2533_v47 }
 0x7c3   :  { %1805 = vrsqrt.f32 %v1455_v2  ;;  %v1456_v5 = vadd.f32 1e-05, %v1454_v4  ;;  %vm1463_vm9 = vweird.f32 %v1455_v2 }
 0x7c5   :  { %1807 = vrsqrt.f32 %v1456_v5  ;;  %vm1473_vm12 = vweird.f32 %v1456_v5 }
 0x7c6   :  { %v1314_v7 = vpop.xlane.xlu0 %1313 }
 0x7c7   :  { %v1315_v8 = vsub.f32 %v1310_v27, %v1314_v7 }
 0x7c9   :  { %v1806_v10 = vpop.eup %1805  ;;  %v1316_v13 = vmul.f32 1.442695, %v1315_v8 }
 0x7ca   :  { %v1458_v14 = vmul.f32 %v1806_v10, %v1455_v2  ;;  %vm1464_vm8 = vweird.f32 %v1806_v10 }
 0x7cb   :  { %v1808_v16 = vpop.eup %1807  ;;  %1809 = vpow2.f32 %v1316_v13  ;;  %vm1465_vm11 = vmor %vm1463_vm9, %vm1464_vm8 }
 0x7cc   :  { %v1459_v9 = vmul.f32 %v1806_v10, %v1458_v14  ;;  %v1468_v19 = vmul.f32 %v1808_v16, %v1456_v5  ;;  %vm1474_vm10 = vweird.f32 %v1808_v16 }
 0x7cd   :  { %vm1475_vm13 = vmor %vm1473_vm12, %vm1474_vm10 }
 0x7ce   :  { %v1460_v55 = vmul.f32 0.5, %v1459_v9  ;;  %v1469_v38 = vmul.f32 %v1808_v16, %v1468_v19 }
 0x7d0   :  { %v1461_v33 = vsub.f32 1.5, %v1460_v55  ;;  %v1470_v39 = vmul.f32 0.5, %v1469_v38 }
 0x7d1   :  { %v1810_v41 = vpop.eup %1809 }
 0x7d2   :  { %v1462_v42 = vmul.f32 %v1806_v10, %v1461_v33  ;;  %v1471_v17 = vsub.f32 1.5, %v1470_v39  ;;  %v1318_v43 = vsel %vm1311_vm7, %v1810_v41, 0.0 }
 0x7d3   :  { %1319 = vadd.xlane.f32.xlu1 %v1318_v43 }
 0x7d4   :  { %v1466_v45 = vsel %vm1465_vm11, %v1806_v10, %v1462_v42  ;;  %v1472_v44 = vmul.f32 %v1808_v16, %v1471_v17 }
 0x7d5   :  { %v1477_v48 = vmul.f32 %v1466_v45, %v1443_v1 }
 0x7d6   :  { %v1476_v49 = vsel %vm1475_vm13, %v1808_v16, %v1472_v44 }
 0x7d7   :  { %v1479_v50 = vmul.f32 %v2555_v11, %v1477_v48  ;;  %v1478_v6 = vmul.f32 %v1476_v49, %v1444_v15 }
 0x7d9   :  { %v1771_v31 = vpop.permute.xlu0 %1770  ;;  %v1481_v52 = vadd.f32 %v2577_v23, %v1479_v50  ;;  %v1480_v54 = vmul.f32 %v2555_v11, %v1478_v6 }
 0x7da   :  { %v1772_v53 = vunpack.i.l.bf16 %v1771_v31  ;;  %v1773_v34 = vunpack.i.h.bf16 %v1771_v31 }
 0x7db   :  { %1755 = vmatmul.msk.f32.vlgmr.msrb.gmra.mxu1 %vm159_vm0, %v1481_v52  ;;  %v1482_v3 = vadd.f32 %v2577_v23, %v1480_v54 }
 0x7dc   :  { %1359 = vmatpush.msra.mxu2 %v1772_v53 }
 0x7de   :  { %1360 = vmatpush.msra.mxu2 %v1773_v34 }
 0x7e3   :  { %1756 = vmatmul.msk.f32.gmra.mxu1 %vm159_vm0, %v1482_v3 }
 0x846   :  { %v1320_v12 = vpop.xlane.xlu1 %1319 }
 0x847   :  { %1811 = vrcp.f32 %v1320_v12  ;;  %v1332_v59 = vand.u32 2147483648, %v1320_v12  ;;  %v1330_v37 = vand.u32 2147483647, %v1320_v12  ;;  %vm1326_vm4 = vweird.f32 %v1320_v12 }
 0x849   :  { %v1333_v23 = vor.u32 1.1754944e-38, %v1332_v59  ;;  %vm1331_vm6 = vcmp.eq.f32.partialorder %v1330_v37, 8.507059e+37  ;;  %v1789_v59 = vld [vmem:[%s2720_s18] ss:$0 sm:$0xff] }
 0x84d   :  { %v1812_v51 = vpop.eup %1811 }
 0x84e   :  { %v1322_v56 = vmul.f32 %v1812_v51, %v1320_v12  ;;  %vm1327_vm3 = vweird.f32 %v1812_v51 }
 0x84f   :  { %vm1328_vm5 = vmor %vm1326_vm4, %vm1327_vm3 }
 0x850   :  { %v1323_v58 = vsub.f32 1.0, %v1322_v56 }
 0x852   :  { %v1324_v60 = vmul.f32 %v1812_v51, %v1323_v58 }
 0x854   :  { %v1325_v11 = vadd.f32 %v1812_v51, %v1324_v60 }
 0x856   :  { %v1329_v61 = vsel %vm1328_vm5, %v1812_v51, %v1325_v11  ;;  %v1790_v11 = vld [vmem:[%s2721_s19] ss:$0 sm:$0xff] }
 0x857   :  { %v1334_v46 = vsel %vm1331_vm6, %v1333_v23, %v1329_v61 }
 0x858   :  { %v1506_v57 = vpop.f32.mrf.mxu1  ;;  %v1335_v40 = vmul.f32 %v1810_v41, %v1334_v46  ;;  %v1187_v46 = vld [vmem:[%s2722_s20] sm:$0x7] }
 0x85a   :  { %1753 = vmatmul.msk.f32.vlgmr.msra.gmra.mxu2 %vm159_vm0, %v1335_v40 }
 0x860   :  { %v1509_v22 = vpop.f32.mrf.mxu1 }
 0x861   :  { %v1774_v32 = vpack.i.bf16 %v1506_v57, %v1509_v22  ;;  %1757 = vmatpush.xpose.msk.msrb.mxu2 %vm159_vm0, %v1509_v22 }
 0x865   :  { %1758 = vmatpush.xpose.msk.msrb.mxu2 %vm159_vm0, %v1506_v57 }
 0x868   :  { %1759 = vmatmul.msk.f32.vlgmr.msrb.gmra.mxu2 %vm159_vm0, %v2616_v28 }
 0x8dd   :  { %v1362_v35 = vpop.f32.mrf.mxu2 }
 0x8de   :  { %1754 = vmatmul.msk.f32.vlgmr.msrb.gmra.mxu0 %vm159_vm0, %v1362_v35 }
 0x8eb   :  { %v1535_v1 = vpop.f32.mrf.mxu2 }
 0x8ec   :  { %v1538_v15 = vmul.f32 0.25, %v1535_v1  ;;  %v1826_v1 = vmov 0  }
 0x8ed   :  { %1779 = vset.pattern.permute.xlu2 %v1826_v1  ;;  %1780 = vset.pattern.permute.xlu0 %v1826_v1 }
 0x8ee   :  { %v1539_v21 = vsel %vm1311_vm7, %v1538_v15, -inf }
 0x8ef   :  { %1540 = vmax.xlane.f32.xlu1 %v1539_v21 }
 0x95b   :  { %v1388_v28 = vpop.f32.mrf.mxu0 }
 0x95c   :  { %v2665_v18 = vadd.f32 %v1788_v20, %v1388_v28 }
 0x95e   :  { %v1391_v25 = vsel %vm1311_vm7, %v2665_v18, 0.0 }
 0x95f   :  { %1392 = vadd.xlane.f32.xlu0 %v1391_v25 }
 0x962   :  { %v1541_v26 = vpop.xlane.xlu1 %1540 }
 0x963   :  { %v1542_v27 = vsub.f32 %v1538_v15, %v1541_v26 }
 0x965   :  { %v1543_v29 = vmul.f32 1.442695, %v1542_v27 }
 0x967   :  { %1813 = vpow2.f32 %v1543_v29 }
 0x96d   :  { %v1814_v30 = vpop.eup %1813 }
 0x96e   :  { %v1545_v62 = vsel %vm1311_vm7, %v1814_v30, 0.0 }
 0x96f   :  { %1546 = vadd.xlane.f32.xlu1 %v1545_v62 }
 0x988   :  { %1775 = vrot.lane.b32.xlu1 %v1774_v32, %s1823_s11 }
 0x9d2   :  { %v1393_v39 = vpop.xlane.xlu0 %1392 }
 0x9d3   :  { %v1394_v41 = vmul.f32 %v1393_v39, %v2533_v47 }
 0x9d5   :  { %v1395_v43 = vsub.f32 %v2665_v18, %v1394_v41 }
 0x9d7   :  { %v1396_v44 = vmul.f32 %v1395_v43, %v1395_v43 }
 0x9d9   :  { %v1397_v48 = vsel %vm1311_vm7, %v1396_v44, 0.0 }
 0x9e2   :  { %v1547_v63 = vpop.xlane.xlu1 %1546 }
 0x9e3   :  { %1815 = vrcp.f32 %v1547_v63  ;;  %v1559_v8 = vand.u32 2147483648, %v1547_v63  ;;  %vm1553_vm15 = vweird.f32 %v1547_v63  ;;  %v1557_v10 = vand.u32 2147483647, %v1547_v63 }
 0x9e5   :  { %v1560_v14 = vor.u32 1.1754944e-38, %v1559_v8  ;;  %vm1558_vm2 = vcmp.eq.f32.partialorder %v1557_v10, 8.507059e+37 }
 0x9e9   :  { %v1816_v0 = vpop.eup %1815 }
 0x9ea   :  { %v1549_v2 = vmul.f32 %v1816_v0, %v1547_v63  ;;  %vm1554_vm14 = vweird.f32 %v1816_v0 }
 0x9eb   :  { %vm1555_vm1 = vmor %vm1553_vm15, %vm1554_vm14 }
 0x9ec   :  { %v1550_v4 = vsub.f32 1.0, %v1549_v2 }
 0x9ee   :  { %v1551_v5 = vmul.f32 %v1816_v0, %v1550_v4 }
 0x9f0   :  { %v1552_v7 = vadd.f32 %v1816_v0, %v1551_v5 }
 0x9f2   :  { %v1556_v13 = vsel %vm1555_vm1, %v1816_v0, %v1552_v7  ;;  %v1188_v0 = vld [vmem:[%s2723_s21] sm:$0x7] }
 0x9f3   :  { %v1561_v9 = vsel %vm1558_vm2, %v1560_v14, %v1556_v13 }
 0x9f4   :  { %v1562_v38 = vmul.f32 %v1814_v30, %v1561_v9 }
 0x9fa   :  { %v1776_v16 = vpop.permute.xlu1 %1775 }
 0x9fb   :  { %v1777_v19 = vunpack.i.l.bf16 %v1776_v16  ;;  %v1778_v55 = vunpack.i.h.bf16 %v1776_v16 }
 0x9fd   :  { %1586 = vmatpush.msra.mxu3 %v1777_v19 }
 0x9ff   :  { %1587 = vmatpush.msra.mxu3 %v1778_v55 }
 0xa00   :  { %1760 = vmatmul.msk.f32.vlgmr.msra.gmra.mxu3 %vm159_vm0, %v1562_v38 }
 0xa83   :  { %v1589_v33 = vpop.f32.mrf.mxu3 }
 0xa84   :  { %1761 = vmatmul.msk.f32.vlgmr.msra.gmra.mxu0 %vm159_vm0, %v1589_v33 }
 0xb01   :  { %v1612_v42 = vpop.f32.mrf.mxu0 }
 0xb02   :  { %v1613_v17 = vadd.f32 %v1788_v20, %v1612_v42 }
 0xb04   :  { %v1615_v45 = vsel %vm1311_vm7, %v1613_v17, 0.0 }
 0xb05   :  { %1616 = vadd.xlane.f32.xlu2 %v1615_v45 }
 0xb0d   :  { %1398 = vadd.xlane.f32.xlu2 %v1397_v48 }
 0xb78   :  { %v1617_v49 = vpop.xlane.xlu2 %1616 }
 0xb79   :  { %v1618_v50 = vmul.f32 %v1617_v49, %v2533_v47 }
 0xb7b   :  { %v1619_v31 = vsub.f32 %v1613_v17, %v1618_v50 }
 0xb7d   :  { %v1620_v52 = vmul.f32 %v1619_v31, %v1619_v31 }
 0xb7f   :  { %v1621_v6 = vsel %vm1311_vm7, %v1620_v52, 0.0 }
 0xb80   :  { %1622 = vadd.xlane.f32.xlu2 %v1621_v6  ;;  %v1399_v53 = vpop.xlane.xlu2 %1398 }
 0xb81   :  { %v1400_v34 = vmul.f32 %v1399_v53, %v2533_v47 }
 0xb83   :  { %v1401_v54 = vadd.f32 1e-05, %v1400_v34 }
 0xb85   :  { %1817 = vrsqrt.f32 %v1401_v54  ;;  %vm1408_vm8 = vweird.f32 %v1401_v54 }
 0xb8b   :  { %v1818_v3 = vpop.eup %1817 }
 0xb8c   :  { %v1403_v12 = vmul.f32 %v1818_v3, %v1401_v54  ;;  %vm1409_vm0 = vweird.f32 %v1818_v3 }
 0xb8d   :  { %vm1410_vm9 = vmor %vm1408_vm8, %vm1409_vm0 }
 0xb8e   :  { %v1404_v24 = vmul.f32 %v1818_v3, %v1403_v12 }
 0xb90   :  { %v1405_v51 = vmul.f32 0.5, %v1404_v24 }
 0xb92   :  { %v1406_v56 = vsub.f32 1.5, %v1405_v51 }
 0xb94   :  { %v1407_v58 = vmul.f32 %v1818_v3, %v1406_v56 }
 0xb96   :  { %v1411_v60 = vsel %vm1410_vm9, %v1818_v3, %v1407_v58 }
 0xb97   :  { %v1412_v37 = vmul.f32 %v1411_v60, %v1395_v43 }
 0xb99   :  { %v1416_v23 = vmul.f32 %v1789_v59, %v1412_v37 }
 0xb9b   :  { %v1420_v61 = vadd.f32 %v1790_v11, %v1416_v23 }
 0xb9d   :  { %v1421_v57 = vadd.f32 %v1420_v61, %v2665_v18 }
 0xb9f   :  { %v1422_v40 = vmul.f32 %v1421_v57, %v1187_v46 }
 0xba1   :  { %v1423_v22 = vsel %vm1311_vm7, %v1422_v40, 0.0 }
 0xba2   :  { %1424 = vadd.xlane.f32.xlu1 %v1423_v22 }
 0xbf3   :  { %v1623_v32 = vpop.xlane.xlu2 %1622 }
 0xbf4   :  { %v1624_v36 = vmul.f32 %v1623_v32, %v2533_v47 }
 0xbf6   :  { %v1625_v35 = vadd.f32 1e-05, %v1624_v36 }
 0xbf8   :  { %1819 = vrsqrt.f32 %v1625_v35  ;;  %vm1632_vm11 = vweird.f32 %v1625_v35 }
 0xbfe   :  { %v1820_v15 = vpop.eup %1819 }
 0xbff   :  { %v1627_v21 = vmul.f32 %v1820_v15, %v1625_v35  ;;  %vm1633_vm10 = vweird.f32 %v1820_v15 }
 0xc00   :  { %vm1634_vm12 = vmor %vm1632_vm11, %vm1633_vm10 }
 0xc01   :  { %v1628_v20 = vmul.f32 %v1820_v15, %v1627_v21 }
 0xc03   :  { %v1629_v28 = vmul.f32 0.5, %v1628_v20 }
 0xc05   :  { %v1630_v25 = vsub.f32 1.5, %v1629_v28 }
 0xc07   :  { %v1631_v26 = vmul.f32 %v1820_v15, %v1630_v25 }
 0xc09   :  { %v1635_v18 = vsel %vm1634_vm12, %v1820_v15, %v1631_v26 }
 0xc0a   :  { %v1636_v27 = vmul.f32 %v1635_v18, %v1619_v31 }
 0xc0c   :  { %v1637_v29 = vmul.f32 %v1789_v59, %v1636_v27 }
 0xc0e   :  { %v1638_v30 = vadd.f32 %v1790_v11, %v1637_v29 }
 0xc10   :  { %v1639_v62 = vadd.f32 %v1638_v30, %v1613_v17 }
 0xc12   :  { %v1640_v47 = vmul.f32 %v1639_v62, %v1187_v46 }
 0xc14   :  { %v1641_v63 = vsel %vm1311_vm7, %v1640_v47, 0.0 }
 0xc15   :  { %1642 = vadd.xlane.f32.xlu2 %v1641_v63  ;;  %v1425_v2 = vpop.xlane.xlu1 %1424 }
 0xc16   :  { %v1426_v4 = vadd.f32 %v1425_v2, %v1188_v0 }
 0xc2d   :  { %1429 = vperm.xlu2 %1779, %v1426_v4  }
 0xc88   :  { %v1643_v5 = vpop.xlane.xlu2 %1642 }
 0xc89   :  { %v1644_v7 = vadd.f32 %v1643_v5, %v1188_v0 }
 0xc8b   :  { %1647 = vperm.xlu0 %1780, %v1644_v7  }
 0xc90   :  { %v1430_v8 = vpop.permute.xlu2 %1429 }
 0xc91   :  { %1432 = vst [vmem:[%s2724_s22] sm:$0x7] %v1430_v8 }
 0xcfd   :  { %v1648_v10 = vpop.permute.xlu0 %1647 }
 0xcfe   :  { %1762 = vst [vmem:[%s2724_s22 + $0x4] sm:$0x7] %v1648_v10 }

</bundles_post_ra>
